<compile_context>
chip_gen: v7x
topology: tpu7x:2x2x1
jax: 0.10.0
libtpu: 0.0.40
codegen_flags: <defaults>
</compile_context>

<pallas_src>
import functools

import jax
import jax.numpy as jnp
from jax.experimental import pallas as pl
from jax.experimental.pallas import tpu as pltpu


# ----------------------------- configuration -----------------------------

# Scoped-VMEM budget that is safe on v5e/v6e (128 MiB physical) and v7x (64 MiB physical),
# and well above the 16/32 MiB defaults so weight-resident blocks double-buffer cleanly.
_VMEM_LIMIT_BYTES = 48 * 1024 * 1024
# Target for double-buffered tile working sets (headroom under the scoped limit).
_TILE_BUDGET_BYTES = 38 * 1024 * 1024
# Exact-path flag for the softmax denominator (approx reciprocal has ~2^-12 rel. error).
_EXACT_SOFTMAX_RECIP = False


# ------------------------------ small helpers ------------------------------

def _round_up(x, m):
    return (x + m - 1) // m * m


def _pad_to(x, shape):
    pads = [(0, t - s) for s, t in zip(x.shape, shape)]
    if all(p == (0, 0) for p in pads):
        return x
    return jnp.pad(x, pads)


def _select_tiles(M, K, N, *, x_bytes, out_bytes, has_resid=False, has_ln_scratch=False):
    """Pick (tm, tn).  Prefer a fully weight-resident N block (weight DMA'd from HBM once,
    stays in VMEM across all row tiles), then the largest row tile whose double-buffered
    working set fits the VMEM budget."""
    Np = _round_up(N, 128)
    if 2 * K * Np * 2 <= _TILE_BUDGET_BYTES // 2:       # double-buffered bf16 weight
        tn = Np                                          # weight resident
    else:
        tn = min(512, Np)                                # fallback: stream weight tiles
    tm = 8
    for cand in (512, 256, 128, 64, 32, 16, 8):
        use = (2 * K * tn * 2                            # weight (bf16, double buffered)
               + 2 * cand * K * x_bytes                  # activation rows
               + 2 * cand * tn * out_bytes)              # output tile
        if has_resid:
            use += 2 * cand * tn * 4                     # f32 residual tile
        if has_ln_scratch:
            use += cand * K * 2                          # bf16 normalized-row scratch
        if use <= _TILE_BUDGET_BYTES:
            tm = cand
            break
    tm = min(tm, _round_up(M, 8))
    return tm, tn


# ----------------------------- Pallas kernels -----------------------------

def _ln_rows(x_ref, g_ref, b_ref):
    x = x_ref[...].astype(jnp.float32)
    mu = jnp.mean(x, axis=-1, keepdims=True)
    var = jnp.mean(jnp.square(x - mu), axis=-1, keepdims=True)
    y = (x - mu) * jax.lax.rsqrt(var + 1e-5)
    return y * g_ref[...] + b_ref[...]


def _ln_matmul_kernel(x_ref, g_ref, b_ref, w_ref, bias_ref, o_ref, y_ref, *, act, n_tiles):
    """LayerNorm(x) @ W + bias (+ QuickGELU).  x:(tm,K) f32, W:(K,tn) bf16."""
    if n_tiles == 1:
        # Weight-resident path (single N block): normalize inline, no scratch round-trip.
        y = _ln_rows(x_ref, g_ref, b_ref).astype(w_ref.dtype)
    else:
        # N-tiled fallback: normalize once per row tile, cache bf16 result in VMEM scratch.
        @pl.when(pl.program_id(1) == 0)
        def _():
            y_ref[...] = _ln_rows(x_ref, g_ref, b_ref).astype(y_ref.dtype)
        y = y_ref[...]

    h = jnp.dot(y, w_ref[...], preferred_element_type=jnp.float32) + bias_ref[...]
    if act == "quickgelu":
        h = h * jax.nn.sigmoid(1.702 * h)        # f32 math (v5e has no bf16 VPU/EUP)
    o_ref[...] = h.astype(o_ref.dtype)


def _matmul_kernel(x_ref, w_ref, bias_ref, o_ref, *, act):
    h = jnp.dot(x_ref[...], w_ref[...], preferred_element_type=jnp.float32)
    h = h + bias_ref[...]
    if act == "quickgelu":
        h = h * jax.nn.sigmoid(1.702 * h)
    o_ref[...] = h.astype(o_ref.dtype)


def _matmul_res_kernel(x_ref, w_ref, bias_ref, r_ref, o_ref):
    h = jnp.dot(x_ref[...], w_ref[...], preferred_element_type=jnp.float32)
    h = h + bias_ref[...] + r_ref[...].astype(jnp.float32)
    o_ref[...] = h.astype(o_ref.dtype)


def _ln_kernel(x_ref, g_ref, b_ref, o_ref):
    o_ref[...] = _ln_rows(x_ref, g_ref, b_ref).astype(o_ref.dtype)


def _flash_attn_kernel(q_ref, k_ref, v_ref, o_ref, m_sc, l_sc, acc_sc,
                       *, kv_len, tk, dh, need_mask):
    kv_i = pl.program_id(2)

    @pl.when(kv_i == 0)
    def _():
        m_sc[...] = jnp.full_like(m_sc, -1e30)
        l_sc[...] = jnp.zeros_like(l_sc)
        acc_sc[...] = jnp.zeros_like(acc_sc)

    # s = q @ k^T per head.  The 1/sqrt(Dh) scale is pre-folded into the Q projection.
    s = jax.lax.dot_general(
        q_ref[...], k_ref[...], (((2,), (2,)), ((0,), (0,))),
        preferred_element_type=jnp.float32)                       # (H, tq, tk) f32

    if need_mask:   # only emitted when padded KV length != true KV length
        col = kv_i * tk + jax.lax.broadcasted_iota(jnp.int32, s.shape, 2)
        s = jnp.where(col < kv_len, s, -1e30)

    m_prev = m_sc[...]
    m_new = jnp.maximum(m_prev, jnp.max(s, axis=-1, keepdims=True))
    alpha = jnp.exp(m_prev - m_new)
    p = jnp.exp(s - m_new)
    l_sc[...] = alpha * l_sc[...] + jnp.sum(p, axis=-1, keepdims=True)
    pv = jax.lax.dot_general(
        p.astype(v_ref.dtype), v_ref[...], (((2,), (1,)), ((0,), (0,))),
        preferred_element_type=jnp.float32)                       # (H, tq, dh) f32
    acc_sc[...] = alpha * acc_sc[...] + pv
    m_sc[...] = m_new

    @pl.when(kv_i == pl.num_programs(2) - 1)
    def _():
        if _EXACT_SOFTMAX_RECIP:
            inv = 1.0 / l_sc[...]
        else:
            inv = pl.reciprocal(l_sc[...], approx=True)
        out = acc_sc[...] * inv                                   # (H, tq, dh) f32
        n_heads = out.shape[0]
        # Merge heads into the lane-dense (tq, H*dh) output block right here, so the
        # head merge happens in the out BlockSpec instead of an XLA HBM transpose.
        for g in range(n_heads):
            o_ref[0, :, g * dh:(g + 1) * dh] = out[g].astype(o_ref.dtype)


# ------------------------------ kernel wrappers ------------------------------

def ln_matmul(x, gamma, beta, w, bias, *, act=None, out_dtype=None):
    """Fused LayerNorm + Linear (+ QuickGELU).  x:(M,K) f32, w:(K,N), bias:(N,)."""
    M, K = x.shape
    N = w.shape[1]
    out_dtype = out_dtype or x.dtype
    tm, tn = _select_tiles(M, K, N, x_bytes=4,
                           out_bytes=jnp.dtype(out_dtype).itemsize,
                           has_ln_scratch=True)
    Mp, Np = _round_up(M, tm), _round_up(N, tn)
    n_tiles = Np // tn

    xp = _pad_to(x.astype(jnp.float32), (Mp, K))
    wp = _pad_to(w.astype(jnp.bfloat16), (K, Np))
    bp = _pad_to(bias.astype(jnp.float32).reshape(1, N), (1, Np))
    g2 = gamma.astype(jnp.float32).reshape(1, K)
    b2 = beta.astype(jnp.float32).reshape(1, K)

    out = pl.pallas_call(
        functools.partial(_ln_matmul_kernel, act=act, n_tiles=n_tiles),
        out_shape=jax.ShapeDtypeStruct((Mp, Np), out_dtype),
        grid=(Mp // tm, n_tiles),
        in_specs=[
            pl.BlockSpec((tm, K), lambda m, n: (m, 0)),
            pl.BlockSpec((1, K), lambda m, n: (0, 0)),
            pl.BlockSpec((1, K), lambda m, n: (0, 0)),
            pl.BlockSpec((K, tn), lambda m, n: (0, n)),   # constant across m -> fetched once
            pl.BlockSpec((1, tn), lambda m, n: (0, n)),
        ],
        out_specs=pl.BlockSpec((tm, tn), lambda m, n: (m, n)),
        scratch_shapes=[pltpu.VMEM((tm, K), jnp.bfloat16)],
        compiler_params=pltpu.CompilerParams(
            dimension_semantics=("parallel", "arbitrary"),
            vmem_limit_bytes=_VMEM_LIMIT_BYTES),
    )(xp, g2, b2, wp, bp)
    return out[:M, :N]


def matmul_bias(x, w, bias=None, *, residual=None, act=None, out_dtype=None):
    """Tiled Linear (+bias, +activation, +residual).  bf16 operands, f32 accumulate."""
    M, K = x.shape
    N = w.shape[1]
    out_dtype = out_dtype or x.dtype
    tm, tn = _select_tiles(M, K, N, x_bytes=2,
                           out_bytes=jnp.dtype(out_dtype).itemsize,
                           has_resid=residual is not None)
    Mp, Np = _round_up(M, tm), _round_up(N, tn)

    xp = _pad_to(x.astype(jnp.bfloat16), (Mp, K))
    wp = _pad_to(w.astype(jnp.bfloat16), (K, Np))
    if bias is None:
        bias = jnp.zeros((N,), jnp.float32)
    bp = _pad_to(bias.astype(jnp.float32).reshape(1, N), (1, Np))

    x_spec = pl.BlockSpec((tm, K), lambda m, n: (m, 0))
    w_spec = pl.BlockSpec((K, tn), lambda m, n: (0, n))   # weight-resident when Np == tn
    b_spec = pl.BlockSpec((1, tn), lambda m, n: (0, n))
    o_spec = pl.BlockSpec((tm, tn), lambda m, n: (m, n))
    cp = pltpu.CompilerParams(dimension_semantics=("parallel", "parallel"),
                              vmem_limit_bytes=_VMEM_LIMIT_BYTES)
    grid = (Mp // tm, Np // tn)

    if residual is None:
        out = pl.pallas_call(
            functools.partial(_matmul_kernel, act=act),
            out_shape=jax.ShapeDtypeStruct((Mp, Np), out_dtype),
            grid=grid, in_specs=[x_spec, w_spec, b_spec], out_specs=o_spec,
            compiler_params=cp,
        )(xp, wp, bp)
    else:
        rp = _pad_to(residual.astype(jnp.float32), (Mp, Np))
        out = pl.pallas_call(
            _matmul_res_kernel,
            out_shape=jax.ShapeDtypeStruct((Mp, Np), out_dtype),
            grid=grid, in_specs=[x_spec, w_spec, b_spec, o_spec], out_specs=o_spec,
            compiler_params=cp,
        )(xp, wp, bp, rp)
    return out[:M, :N]


def layernorm(x, gamma, beta, *, tr=512):
    """Row-tiled LayerNorm.  x:(M,D) f32."""
    M, D = x.shape
    tr = min(tr, _round_up(M, 8))
    Mp = _round_up(M, tr)
    xp = _pad_to(x, (Mp, D))
    out = pl.pallas_call(
        _ln_kernel,
        out_shape=jax.ShapeDtypeStruct((Mp, D), x.dtype),
        grid=(Mp // tr,),
        in_specs=[pl.BlockSpec((tr, D), lambda i: (i, 0)),
                  pl.BlockSpec((1, D), lambda i: (0, 0)),
                  pl.BlockSpec((1, D), lambda i: (0, 0))],
        out_specs=pl.BlockSpec((tr, D), lambda i: (i, 0)),
        compiler_params=pltpu.CompilerParams(
            dimension_semantics=("parallel",),
            vmem_limit_bytes=_VMEM_LIMIT_BYTES),
    )(xp, gamma.astype(jnp.float32).reshape(1, D), beta.astype(jnp.float32).reshape(1, D))
    return out[:M]


def flash_attention(q, k, v, *, heads, out_dtype=jnp.bfloat16, tq=512, tk=512):
    """q, k, v: (B*heads, S, Dh) bf16.  Returns (B, S, heads*Dh) bf16 with heads merged
    lane-dense by the kernel / out BlockSpec (no XLA head-merge transpose)."""
    BH, S, Dh = q.shape
    B = BH // heads
    D = heads * Dh

    tq = min(tq, _round_up(S, 8))
    tk = min(tk, _round_up(S, 8))
    Sq, Sk = _round_up(S, tq), _round_up(S, tk)

    qp = _pad_to(q, (BH, Sq, Dh))
    kp = _pad_to(k, (BH, Sk, Dh))
    vp = _pad_to(v, (BH, Sk, Dh))

    out = pl.pallas_call(
        functools.partial(_flash_attn_kernel, kv_len=S, tk=tk, dh=Dh,
                          need_mask=(Sk != S)),
        out_shape=jax.ShapeDtypeStruct((B, Sq, D), out_dtype),
        grid=(B, Sq // tq, Sk // tk),
        in_specs=[
            pl.BlockSpec((heads, tq, Dh), lambda b, qi, ki: (b, qi, 0)),
            pl.BlockSpec((heads, tk, Dh), lambda b, qi, ki: (b, ki, 0)),
            pl.BlockSpec((heads, tk, Dh), lambda b, qi, ki: (b, ki, 0)),
        ],
        out_specs=pl.BlockSpec((1, tq, D), lambda b, qi, ki: (b, qi, 0)),
        scratch_shapes=[pltpu.VMEM((heads, tq, 1), jnp.float32),
                        pltpu.VMEM((heads, tq, 1), jnp.float32),
                        pltpu.VMEM((heads, tq, Dh), jnp.float32)],
        compiler_params=pltpu.CompilerParams(
            dimension_semantics=("parallel", "parallel", "arbitrary"),
            vmem_limit_bytes=_VMEM_LIMIT_BYTES),
    )(qp, kp, vp)
    return out[:, :S, :]


# --------------------------- model glue (plain JAX) ---------------------------

def init_params(key, *, in_channels, patch, width, layers, output_dim, n_tokens):
    scale = width ** -0.5
    keys = jax.random.split(key, 4 + layers)
    d = width
    params = {
        "conv_w": 0.02 * jax.random.normal(
            keys[0], (width, in_channels, patch, patch), jnp.float32),
        "class_embedding": scale * jax.random.normal(keys[1], (width,), jnp.float32),
        "pos_emb": scale * jax.random.normal(keys[2], (n_tokens, width), jnp.float32),
        "ln_pre_g": jnp.ones((d,), jnp.float32), "ln_pre_b": jnp.zeros((d,), jnp.float32),
        "ln_post_g": jnp.ones((d,), jnp.float32), "ln_post_b": jnp.zeros((d,), jnp.float32),
        "proj": scale * jax.random.normal(keys[3], (width, output_dim), jnp.float32),
        "blocks": [],
    }
    for l in range(layers):
        bk = jax.random.split(keys[4 + l], 4)
        blk = {
            "ln1_g": jnp.ones((d,), jnp.float32), "ln1_b": jnp.zeros((d,), jnp.float32),
            "ln2_g": jnp.ones((d,), jnp.float32), "ln2_b": jnp.zeros((d,), jnp.float32),
            # fused QKV weight (D, 3D); matmul weights stored in bf16 (f32 accumulate)
            "w_qkv": (0.02 * jax.random.normal(bk[0], (d, 3 * d), jnp.float32)
                      ).astype(jnp.bfloat16),
            "b_qkv": jnp.zeros((3 * d,), jnp.float32),
            "wo": (0.02 * jax.random.normal(bk[1], (d, d), jnp.float32)).astype(jnp.bfloat16),
            "bo": jnp.zeros((d,), jnp.float32),
            "w1": (0.02 * jax.random.normal(bk[2], (d, 4 * d), jnp.float32)).astype(jnp.bfloat16),
            "b1": jnp.zeros((4 * d,), jnp.float32),
            "w2": (0.02 * jax.random.normal(bk[3], (4 * d, d), jnp.float32)).astype(jnp.bfloat16),
            "b2": jnp.zeros((d,), jnp.float32),
        }
        params["blocks"].append(blk)
    return params


def _fold_attention_scale(blk, heads):
    """Fold the 1/sqrt(Dh) attention scale into the Q columns of the fused QKV projection
    (pure reparametrization; forward semantics unchanged)."""
    D = blk["wo"].shape[0]
    scale = (D // heads) ** -0.5
    col = jnp.concatenate([jnp.full((D,), scale, jnp.float32),
                           jnp.ones((2 * D,), jnp.float32)])
    out = dict(blk)
    out["w_qkv"] = (blk["w_qkv"].astype(jnp.float32) * col[None, :]).astype(blk["w_qkv"].dtype)
    out["b_qkv"] = (blk["b_qkv"].astype(jnp.float32) * col).astype(blk["b_qkv"].dtype)
    return out


def residual_attention_block(x2d, blk, *, B, S, heads):
    """x2d: (B*S, D) f32 residual stream -> (B*S, D) f32.  Pre-LN CLIP block."""
    D = x2d.shape[1]
    Dh = D // heads

    # (a) LN1 + fused QKV projection (attention scale pre-folded into the Q columns)
    qkv = ln_matmul(x2d, blk["ln1_g"], blk["ln1_b"], blk["w_qkv"], blk["b_qkv"],
                    out_dtype=jnp.bfloat16)                       # (B*S, 3D) bf16

    # TODO(synk): the q/k/v head split below is still an XLA transpose; folding it into the
    # flash kernel's input BlockSpecs needs per-head relayout inside the kernel (follow-up).
    def split_heads(t):
        return (t.reshape(B, S, heads, Dh).transpose(0, 2, 1, 3)
                 .reshape(B * heads, S, Dh))

    q = split_heads(qkv[:, :D])
    k = split_heads(qkv[:, D:2 * D])
    v = split_heads(qkv[:, 2 * D:])

    # attention: kernel emits (B, S, D) with heads already merged lane-dense
    o = flash_attention(q, k, v, heads=heads).reshape(B * S, D)    # free reshape

    # (b) attention out-proj + residual add
    x2d = matmul_bias(o, blk["wo"], blk["bo"], residual=x2d, out_dtype=jnp.float32)

    # (c) LN2 + FC1 + QuickGELU
    h = ln_matmul(x2d, blk["ln2_g"], blk["ln2_b"], blk["w1"], blk["b1"],
                  act="quickgelu", out_dtype=jnp.bfloat16)        # (B*S, 4D) bf16

    # (d) FC2 + residual add
    # TODO(synk): fusing (b)+(c) and (d)+(next LN1) would save two f32 residual re-reads
    # per layer; left for a follow-up.
    x2d = matmul_bias(h, blk["w2"], blk["b2"], residual=x2d, out_dtype=jnp.float32)
    return x2d


def tc_vision_transformer_forward(x, params, *, patch, heads):
    """x: (B, T, C, H, W) f32.  Returns (cls_tokens, context_tokens, attns, source)."""
    B, T, C, H, W = x.shape
    D = params["conv_w"].shape[0]
    Hp, Wp = H // patch, W // patch
    N = Hp * Wp
    BT = B * T
    S = T * (N + 1)

    # --- conv1 (stride = kernel = patch, no bias) as im2col + weight-resident matmul ---
    patches = (x.reshape(BT, C, Hp, patch, Wp, patch)
                 .transpose(0, 2, 4, 1, 3, 5)
                 .reshape(BT * N, C * patch * patch))
    w_conv = params["conv_w"].reshape(D, C * patch * patch).T      # (C*p*p, D)
    feat = matmul_bias(patches, w_conv, out_dtype=jnp.float32).reshape(BT, N, D)

    # --- prepend class token, add 'space' positional embedding ---
    cls = jnp.broadcast_to(params["class_embedding"].reshape(1, 1, D), (BT, 1, D))
    xtok = jnp.concatenate([cls, feat], axis=1) + params["pos_emb"][None, :, :]

    # rearrange '(B T) N D -> B (T N) D'
    x2d = xtok.reshape(B, S, D).reshape(B * S, D)

    # --- ln_pre (row-tiled standalone LN) ---
    x2d = layernorm(x2d, params["ln_pre_g"], params["ln_pre_b"])

    # --- transformer (ToMe disabled: tome_r = tome_d = 0) ---
    for blk in params["blocks"]:
        x2d = residual_attention_block(x2d, _fold_attention_scale(blk, heads),
                                       B=B, S=S, heads=heads)

    # move the T per-frame class tokens to the front of the sequence
    x4 = x2d.reshape(B, T, N + 1, D)
    cls_tok = x4[:, :, 0, :]                                       # (B, T, D)
    ctx_tok = x4[:, :, 1:, :].reshape(B, T * N, D)
    xseq = jnp.concatenate([cls_tok, ctx_tok], axis=1).reshape(B * S, D)

    # --- ln_post fused with projection ---
    out_dim = params["proj"].shape[1]
    y = ln_matmul(xseq, params["ln_post_g"], params["ln_post_b"],
                  params["proj"], jnp.zeros((out_dim,), jnp.float32),
                  out_dtype=jnp.float32)
    y = y.reshape(B, S, out_dim)[:, None, :, :]                    # (B, 1, S, out_dim)

    cls_tokens = y[:, :, :T, :]
    context_tokens = y[:, :, T:, :]
    attns, source = None, None          # return_attention=False, return_source=False
    return cls_tokens, context_tokens, attns, source


# --------------------------------- main ---------------------------------

if __name__ == "__main__":
    # small, shape-consistent config
    B, T, C, H, W = 2, 2, 3, 16, 16
    patch_size = 8
    width = 32
    layers = 2
    heads = 2
    output_dim = 16
    N = (H // patch_size) * (W // patch_size)

    key = jax.random.PRNGKey(0)
    x_key, p_key = jax.random.split(key)
    x = jax.random.normal(x_key, (B, T, C, H, W), jnp.float32)

    params = init_params(
        p_key, in_channels=C, patch=patch_size, width=width, layers=layers,
        output_dim=output_dim, n_tokens=N + 1)

    fwd = jax.jit(functools.partial(
        tc_vision_transformer_forward, patch=patch_size, heads=heads))
    cls_tokens, context_tokens, attns, source = fwd(x, params)

    jax.block_until_ready((cls_tokens, context_tokens))
    assert cls_tokens.shape == (B, 1, T, output_dim)
    assert context_tokens.shape == (B, 1, T * N, output_dim)
    assert bool(jnp.all(jnp.isfinite(cls_tokens))) and bool(jnp.all(jnp.isfinite(context_tokens)))
    print("KERNEL_OK")
</pallas_src>

<mosaic_0001>
module attributes {stable_mosaic.version = 11 : i64} {
  func.func @_matmul_kernel(%arg0: i32, %arg1: i32, %arg2: memref<16x192xbf16, #tpu.memory_space<vmem>>, %arg3: memref<192x128xbf16, #tpu.memory_space<vmem>>, %arg4: memref<1x128xf32, #tpu.memory_space<vmem>>, %arg5: memref<16x128xf32, #tpu.memory_space<vmem>>) attributes {dimension_semantics = [#tpu.dimension_semantics<parallel>, #tpu.dimension_semantics<parallel>], iteration_bounds = array<i64: 1, 1>, scalar_prefetch = 0 : i64, scratch_operands = 0 : i64, tpu.core_type = #tpu.core_type<tc>, window_params = [{transform_indices = @transform_0, window_bounds = array<i64: 16, 192>}, {transform_indices = @transform_1, window_bounds = array<i64: 192, 128>}, {transform_indices = @transform_2, window_bounds = array<i64: 1, 128>}, {transform_indices = @transform_3, window_bounds = array<i64: 16, 128>}]} {
    %c0 = arith.constant 0 : index
    %c0_0 = arith.constant 0 : index
    %0 = vector.load %arg2[%c0, %c0_0] : memref<16x192xbf16, #tpu.memory_space<vmem>>, vector<16x192xbf16>
    %c0_1 = arith.constant 0 : index
    %c0_2 = arith.constant 0 : index
    %1 = vector.load %arg3[%c0_1, %c0_2] : memref<192x128xbf16, #tpu.memory_space<vmem>>, vector<192x128xbf16>
    %cst = arith.constant dense<0.000000e+00> : vector<16x128xf32>
    %2 = tpu.matmul %0, %1, %cst {dimension_numbers = #tpu.dot_dimension_numbers<[1], [0], [0], [1], [0, 0, 1, 1], [], []>} : vector<16x192xbf16>, vector<192x128xbf16>, vector<16x128xf32> -> vector<16x128xf32>
    %c0_3 = arith.constant 0 : index
    %c0_4 = arith.constant 0 : index
    %3 = vector.load %arg4[%c0_3, %c0_4] : memref<1x128xf32, #tpu.memory_space<vmem>>, vector<1x128xf32>
    %4 = vector.broadcast %3 : vector<1x128xf32> to vector<16x128xf32>
    %5 = arith.addf %2, %4 : vector<16x128xf32>
    %c0_5 = arith.constant 0 : index
    %c0_6 = arith.constant 0 : index
    %6 = vector.load %arg5[%c0_5, %c0_6] : memref<16x128xf32, #tpu.memory_space<vmem>>, vector<16x128xf32>
    tpu.vector_store %arg5[%c0_5, %c0_6], %5 {strides = array<i32>} : memref<16x128xf32, #tpu.memory_space<vmem>>, vector<16x128xf32>,
    return
  }
  func.func @transform_0(%arg0: i32, %arg1: i32) -> (i32, i32) {
    %c0_i32 = arith.constant 0 : i32
    %c0_i32_0 = arith.constant 0 : i32
    return %arg0, %c0_i32 : i32, i32
  }
  func.func @transform_1(%arg0: i32, %arg1: i32) -> (i32, i32) {
    %c0_i32 = arith.constant 0 : i32
    %c0_i32_0 = arith.constant 0 : i32
    return %c0_i32, %arg1 : i32, i32
  }
  func.func @transform_2(%arg0: i32, %arg1: i32) -> (i32, i32) {
    %c0_i32 = arith.constant 0 : i32
    %c0_i32_0 = arith.constant 0 : i32
    return %c0_i32, %arg1 : i32, i32
  }
  func.func @transform_3(%arg0: i32, %arg1: i32) -> (i32, i32) {
    %c0_i32 = arith.constant 0 : i32
    return %arg0, %arg1 : i32, i32
  }
}

module attributes {stable_mosaic.version = 11 : i64} {
  func.func @_ln_kernel(%arg0: i32, %arg1: memref<24x32xf32, #tpu.memory_space<vmem>>, %arg2: memref<1x32xf32, #tpu.memory_space<vmem>>, %arg3: memref<1x32xf32, #tpu.memory_space<vmem>>, %arg4: memref<24x32xf32, #tpu.memory_space<vmem>>) attributes {dimension_semantics = [#tpu.dimension_semantics<parallel>], iteration_bounds = array<i64: 1>, scalar_prefetch = 0 : i64, scratch_operands = 0 : i64, tpu.core_type = #tpu.core_type<tc>, window_params = [{transform_indices = @transform_0, window_bounds = array<i64: 24, 32>}, {pipeline_mode = #tpu.pipeline_mode<synchronous>, transform_indices = @transform_1, window_bounds = array<i64: 1, 32>}, {pipeline_mode = #tpu.pipeline_mode<synchronous>, transform_indices = @transform_2, window_bounds = array<i64: 1, 32>}, {transform_indices = @transform_3, window_bounds = array<i64: 24, 32>}]} {
    %c0 = arith.constant 0 : index
    %c0_0 = arith.constant 0 : index
    %0 = vector.load %arg1[%c0, %c0_0] : memref<24x32xf32, #tpu.memory_space<vmem>>, vector<24x32xf32>
    %cst = arith.constant dense<0.000000e+00> : vector<24xf32>
    %1 = vector.multi_reduction <add>, %0, %cst [1] : vector<24x32xf32> to vector<24xf32>
    %2 = vector.shape_cast %1 : vector<24xf32> to vector<24x1xf32>
    %cst_1 = arith.constant 3.200000e+01 : f32
    %3 = vector.broadcast %cst_1 : f32 to vector<24x1xf32>
    %4 = arith.divf %2, %3 : vector<24x1xf32>
    %5 = vector.broadcast %4 : vector<24x1xf32> to vector<24x32xf32>
    %6 = arith.subf %0, %5 : vector<24x32xf32>
    %7 = arith.mulf %6, %6 : vector<24x32xf32>
    %cst_2 = arith.constant dense<0.000000e+00> : vector<24xf32>
    %8 = vector.multi_reduction <add>, %7, %cst_2 [1] : vector<24x32xf32> to vector<24xf32>
    %9 = vector.shape_cast %8 : vector<24xf32> to vector<24x1xf32>
    %cst_3 = arith.constant 3.200000e+01 : f32
    %10 = vector.broadcast %cst_3 : f32 to vector<24x1xf32>
    %11 = arith.divf %9, %10 : vector<24x1xf32>
    %12 = vector.broadcast %4 : vector<24x1xf32> to vector<24x32xf32>
    %13 = arith.subf %0, %12 : vector<24x32xf32>
    %cst_4 = arith.constant 9.99999974E-6 : f32
    %14 = vector.broadcast %cst_4 : f32 to vector<24x1xf32>
    %15 = arith.addf %11, %14 : vector<24x1xf32>
    %16 = math.rsqrt %15 : vector<24x1xf32>
    %17 = vector.broadcast %16 : vector<24x1xf32> to vector<24x32xf32>
    %18 = arith.mulf %13, %17 : vector<24x32xf32>
    %c0_5 = arith.constant 0 : index
    %c0_6 = arith.constant 0 : index
    %19 = vector.load %arg2[%c0_5, %c0_6] : memref<1x32xf32, #tpu.memory_space<vmem>>, vector<1x32xf32>
    %20 = vector.broadcast %19 : vector<1x32xf32> to vector<24x32xf32>
    %21 = arith.mulf %18, %20 : vector<24x32xf32>
    %c0_7 = arith.constant 0 : index
    %c0_8 = arith.constant 0 : index
    %22 = vector.load %arg3[%c0_7, %c0_8] : memref<1x32xf32, #tpu.memory_space<vmem>>, vector<1x32xf32>
    %23 = vector.broadcast %22 : vector<1x32xf32> to vector<24x32xf32>
    %24 = arith.addf %21, %23 : vector<24x32xf32>
    %c0_9 = arith.constant 0 : index
    %c0_10 = arith.constant 0 : index
    %25 = vector.load %arg4[%c0_9, %c0_10] : memref<24x32xf32, #tpu.memory_space<vmem>>, vector<24x32xf32>
    tpu.vector_store %arg4[%c0_9, %c0_10], %24 {strides = array<i32>} : memref<24x32xf32, #tpu.memory_space<vmem>>, vector<24x32xf32>,
    return
  }
  func.func @transform_0(%arg0: i32) -> (i32, i32) {
    %c0_i32 = arith.constant 0 : i32
    %c0_i32_0 = arith.constant 0 : i32
    return %arg0, %c0_i32 : i32, i32
  }
  func.func @transform_1(%arg0: i32) -> (i32, i32) {
    %c0_i32 = arith.constant 0 : i32
    %c0_i32_0 = arith.constant 0 : i32
    %c0_i32_1 = arith.constant 0 : i32
    return %c0_i32, %c0_i32_0 : i32, i32
  }
  func.func @transform_2(%arg0: i32) -> (i32, i32) {
    %c0_i32 = arith.constant 0 : i32
    %c0_i32_0 = arith.constant 0 : i32
    %c0_i32_1 = arith.constant 0 : i32
    return %c0_i32, %c0_i32_0 : i32, i32
  }
  func.func @transform_3(%arg0: i32) -> (i32, i32) {
    %c0_i32 = arith.constant 0 : i32
    %c0_i32_0 = arith.constant 0 : i32
    return %arg0, %c0_i32 : i32, i32
  }
}

module attributes {stable_mosaic.version = 11 : i64} {
  func.func @_ln_matmul_kernel(%arg0: i32, %arg1: i32, %arg2: memref<24x32xf32, #tpu.memory_space<vmem>>, %arg3: memref<1x32xf32, #tpu.memory_space<vmem>>, %arg4: memref<1x32xf32, #tpu.memory_space<vmem>>, %arg5: memref<32x128xbf16, #tpu.memory_space<vmem>>, %arg6: memref<1x128xf32, #tpu.memory_space<vmem>>, %arg7: memref<24x128xbf16, #tpu.memory_space<vmem>>, %arg8: memref<24x32xbf16, #tpu.memory_space<vmem>>) attributes {dimension_semantics = [#tpu.dimension_semantics<parallel>, #tpu.dimension_semantics<arbitrary>], iteration_bounds = array<i64: 1, 1>, scalar_prefetch = 0 : i64, scratch_operands = 1 : i64, tpu.core_type = #tpu.core_type<tc>, window_params = [{transform_indices = @transform_0, window_bounds = array<i64: 24, 32>}, {pipeline_mode = #tpu.pipeline_mode<synchronous>, transform_indices = @transform_1, window_bounds = array<i64: 1, 32>}, {pipeline_mode = #tpu.pipeline_mode<synchronous>, transform_indices = @transform_2, window_bounds = array<i64: 1, 32>}, {transform_indices = @transform_3, window_bounds = array<i64: 32, 128>}, {transform_indices = @transform_4, window_bounds = array<i64: 1, 128>}, {transform_indices = @transform_5, window_bounds = array<i64: 24, 128>}]} {
    %c0 = arith.constant 0 : index
    %c0_0 = arith.constant 0 : index
    %0 = vector.load %arg2[%c0, %c0_0] : memref<24x32xf32, #tpu.memory_space<vmem>>, vector<24x32xf32>
    %cst = arith.constant dense<0.000000e+00> : vector<24xf32>
    %1 = vector.multi_reduction <add>, %0, %cst [1] : vector<24x32xf32> to vector<24xf32>
    %2 = vector.shape_cast %1 : vector<24xf32> to vector<24x1xf32>
    %cst_1 = arith.constant 3.200000e+01 : f32
    %3 = vector.broadcast %cst_1 : f32 to vector<24x1xf32>
    %4 = arith.divf %2, %3 : vector<24x1xf32>
    %5 = vector.broadcast %4 : vector<24x1xf32> to vector<24x32xf32>
    %6 = arith.subf %0, %5 : vector<24x32xf32>
    %7 = arith.mulf %6, %6 : vector<24x32xf32>
    %cst_2 = arith.constant dense<0.000000e+00> : vector<24xf32>
    %8 = vector.multi_reduction <add>, %7, %cst_2 [1] : vector<24x32xf32> to vector<24xf32>
    %9 = vector.shape_cast %8 : vector<24xf32> to vector<24x1xf32>
    %cst_3 = arith.constant 3.200000e+01 : f32
    %10 = vector.broadcast %cst_3 : f32 to vector<24x1xf32>
    %11 = arith.divf %9, %10 : vector<24x1xf32>
    %12 = vector.broadcast %4 : vector<24x1xf32> to vector<24x32xf32>
    %13 = arith.subf %0, %12 : vector<24x32xf32>
    %cst_4 = arith.constant 9.99999974E-6 : f32
    %14 = vector.broadcast %cst_4 : f32 to vector<24x1xf32>
    %15 = arith.addf %11, %14 : vector<24x1xf32>
    %16 = math.rsqrt %15 : vector<24x1xf32>
    %17 = vector.broadcast %16 : vector<24x1xf32> to vector<24x32xf32>
    %18 = arith.mulf %13, %17 : vector<24x32xf32>
    %c0_5 = arith.constant 0 : index
    %c0_6 = arith.constant 0 : index
    %19 = vector.load %arg3[%c0_5, %c0_6] : memref<1x32xf32, #tpu.memory_space<vmem>>, vector<1x32xf32>
    %20 = vector.broadcast %19 : vector<1x32xf32> to vector<24x32xf32>
    %21 = arith.mulf %18, %20 : vector<24x32xf32>
    %c0_7 = arith.constant 0 : index
    %c0_8 = arith.constant 0 : index
    %22 = vector.load %arg4[%c0_7, %c0_8] : memref<1x32xf32, #tpu.memory_space<vmem>>, vector<1x32xf32>
    %23 = vector.broadcast %22 : vector<1x32xf32> to vector<24x32xf32>
    %24 = arith.addf %21, %23 : vector<24x32xf32>
    %25 = arith.truncf %24 : vector<24x32xf32> to vector<24x32xbf16>
    %c0_9 = arith.constant 0 : index
    %c0_10 = arith.constant 0 : index
    %26 = vector.load %arg5[%c0_9, %c0_10] : memref<32x128xbf16, #tpu.memory_space<vmem>>, vector<32x128xbf16>
    %cst_11 = arith.constant dense<0.000000e+00> : vector<24x128xf32>
    %27 = tpu.matmul %25, %26, %cst_11 {dimension_numbers = #tpu.dot_dimension_numbers<[1], [0], [0], [1], [0, 0, 1, 1], [], []>} : vector<24x32xbf16>, vector<32x128xbf16>, vector<24x128xf32> -> vector<24x128xf32>
    %c0_12 = arith.constant 0 : index
    %c0_13 = arith.constant 0 : index
    %28 = vector.load %arg6[%c0_12, %c0_13] : memref<1x128xf32, #tpu.memory_space<vmem>>, vector<1x128xf32>
    %29 = vector.broadcast %28 : vector<1x128xf32> to vector<24x128xf32>
    %30 = arith.addf %27, %29 : vector<24x128xf32>
    %31 = arith.truncf %30 : vector<24x128xf32> to vector<24x128xbf16>
    %c0_14 = arith.constant 0 : index
    %c0_15 = arith.constant 0 : index
    %32 = vector.load %arg7[%c0_14, %c0_15] : memref<24x128xbf16, #tpu.memory_space<vmem>>, vector<24x128xbf16>
    tpu.vector_store %arg7[%c0_14, %c0_15], %31 {strides = array<i32>} : memref<24x128xbf16, #tpu.memory_space<vmem>>, vector<24x128xbf16>,
    return
  }
  func.func @transform_0(%arg0: i32, %arg1: i32) -> (i32, i32) {
    %c0_i32 = arith.constant 0 : i32
    %c0_i32_0 = arith.constant 0 : i32
    return %arg0, %c0_i32 : i32, i32
  }
  func.func @transform_1(%arg0: i32, %arg1: i32) -> (i32, i32) {
    %c0_i32 = arith.constant 0 : i32
    %c0_i32_0 = arith.constant 0 : i32
    %c0_i32_1 = arith.constant 0 : i32
    return %c0_i32, %c0_i32_0 : i32, i32
  }
  func.func @transform_2(%arg0: i32, %arg1: i32) -> (i32, i32) {
    %c0_i32 = arith.constant 0 : i32
    %c0_i32_0 = arith.constant 0 : i32
    %c0_i32_1 = arith.constant 0 : i32
    return %c0_i32, %c0_i32_0 : i32, i32
  }
  func.func @transform_3(%arg0: i32, %arg1: i32) -> (i32, i32) {
    %c0_i32 = arith.constant 0 : i32
    %c0_i32_0 = arith.constant 0 : i32
    return %c0_i32, %arg1 : i32, i32
  }
  func.func @transform_4(%arg0: i32, %arg1: i32) -> (i32, i32) {
    %c0_i32 = arith.constant 0 : i32
    %c0_i32_0 = arith.constant 0 : i32
    return %c0_i32, %arg1 : i32, i32
  }
  func.func @transform_5(%arg0: i32, %arg1: i32) -> (i32, i32) {
    %c0_i32 = arith.constant 0 : i32
    return %arg0, %arg1 : i32, i32
  }
}

module attributes {stable_mosaic.version = 11 : i64} {
  func.func @_flash_attn_kernel(%arg0: i32, %arg1: i32, %arg2: i32, %arg3: memref<2x16x16xbf16, #tpu.memory_space<vmem>>, %arg4: memref<2x16x16xbf16, #tpu.memory_space<vmem>>, %arg5: memref<2x16x16xbf16, #tpu.memory_space<vmem>>, %arg6: memref<1x16x32xbf16, #tpu.memory_space<vmem>>, %arg7: memref<2x16x1xf32, #tpu.memory_space<vmem>>, %arg8: memref<2x16x1xf32, #tpu.memory_space<vmem>>, %arg9: memref<2x16x16xf32, #tpu.memory_space<vmem>>) attributes {dimension_semantics = [#tpu.dimension_semantics<parallel>, #tpu.dimension_semantics<parallel>, #tpu.dimension_semantics<arbitrary>], iteration_bounds = array<i64: 2, 1, 1>, scalar_prefetch = 0 : i64, scratch_operands = 3 : i64, tpu.core_type = #tpu.core_type<tc>, window_params = [{transform_indices = @transform_0, window_bounds = array<i64: 2, 16, 16>}, {transform_indices = @transform_1, window_bounds = array<i64: 2, 16, 16>}, {transform_indices = @transform_2, window_bounds = array<i64: 2, 16, 16>}, {transform_indices = @transform_3, window_bounds = array<i64: 1, 16, 32>}]} {
    %c0_i32 = arith.constant 0 : i32
    %0 = arith.cmpi eq, %arg2, %c0_i32 : i32
    %1 = arith.extui %0 : i1 to i32
    %c0_i32_0 = arith.constant 0 : i32
    %2 = arith.cmpi ne, %1, %c0_i32_0 : i32
    scf.if %2 {
      %cst_33 = arith.constant -1.000000e+30 : f32
      %41 = vector.broadcast %cst_33 : f32 to vector<2x16x1xf32>
      %c0_34 = arith.constant 0 : index
      %c0_35 = arith.constant 0 : index
      %c0_36 = arith.constant 0 : index
      %42 = vector.load %arg7[%c0_34, %c0_35, %c0_36] : memref<2x16x1xf32, #tpu.memory_space<vmem>>, vector<2x16x1xf32>
      tpu.vector_store %arg7[%c0_34, %c0_35, %c0_36], %41 {strides = array<i32>} : memref<2x16x1xf32, #tpu.memory_space<vmem>>, vector<2x16x1xf32>,
      %cst_37 = arith.constant 0.000000e+00 : f32
      %43 = vector.broadcast %cst_37 : f32 to vector<2x16x1xf32>
      %c0_38 = arith.constant 0 : index
      %c0_39 = arith.constant 0 : index
      %c0_40 = arith.constant 0 : index
      %44 = vector.load %arg8[%c0_38, %c0_39, %c0_40] : memref<2x16x1xf32, #tpu.memory_space<vmem>>, vector<2x16x1xf32>
      tpu.vector_store %arg8[%c0_38, %c0_39, %c0_40], %43 {strides = array<i32>} : memref<2x16x1xf32, #tpu.memory_space<vmem>>, vector<2x16x1xf32>,
      %cst_41 = arith.constant 0.000000e+00 : f32
      %45 = vector.broadcast %cst_41 : f32 to vector<2x16x16xf32>
      %c0_42 = arith.constant 0 : index
      %c0_43 = arith.constant 0 : index
      %c0_44 = arith.constant 0 : index
      %46 = vector.load %arg9[%c0_42, %c0_43, %c0_44] : memref<2x16x16xf32, #tpu.memory_space<vmem>>, vector<2x16x16xf32>
      tpu.vector_store %arg9[%c0_42, %c0_43, %c0_44], %45 {strides = array<i32>} : memref<2x16x16xf32, #tpu.memory_space<vmem>>, vector<2x16x16xf32>,
    } else {
    }
    %c0 = arith.constant 0 : index
    %c0_1 = arith.constant 0 : index
    %c0_2 = arith.constant 0 : index
    %3 = vector.load %arg3[%c0, %c0_1, %c0_2] : memref<2x16x16xbf16, #tpu.memory_space<vmem>>, vector<2x16x16xbf16>
    %c0_3 = arith.constant 0 : index
    %c0_4 = arith.constant 0 : index
    %c0_5 = arith.constant 0 : index
    %4 = vector.load %arg4[%c0_3, %c0_4, %c0_5] : memref<2x16x16xbf16, #tpu.memory_space<vmem>>, vector<2x16x16xbf16>
    %cst = arith.constant dense<0.000000e+00> : vector<2x16x16xf32>
    %5 = tpu.matmul %3, %4, %cst {dimension_numbers = #tpu.dot_dimension_numbers<[2], [2], [1], [1], [0, 0, 0, 1, 1, 1], [0], [0]>} : vector<2x16x16xbf16>, vector<2x16x16xbf16>, vector<2x16x16xf32> -> vector<2x16x16xf32>
    %c16_i32 = arith.constant 16 : i32
    %6 = arith.muli %arg2, %c16_i32 : i32
    %7 = tpu.iota {dimensions = array<i32: 2>} : vector<2x16x16xi32>
    %8 = vector.broadcast %6 : i32 to vector<2x16x16xi32>
    %9 = arith.addi %8, %7 : vector<2x16x16xi32>
    %c10_i32 = arith.constant 10 : i32
    %10 = vector.broadcast %c10_i32 : i32 to vector<2x16x16xi32>
    %11 = arith.cmpi slt, %9, %10 : vector<2x16x16xi32>
    %cst_6 = arith.constant -1.000000e+30 : f32
    %12 = vector.broadcast %cst_6 : f32 to vector<2x16x16xf32>
    %13 = arith.select %11, %5, %12 : vector<2x16x16xi1>, vector<2x16x16xf32>
    %c0_7 = arith.constant 0 : index
    %c0_8 = arith.constant 0 : index
    %c0_9 = arith.constant 0 : index
    %14 = vector.load %arg7[%c0_7, %c0_8, %c0_9] : memref<2x16x1xf32, #tpu.memory_space<vmem>>, vector<2x16x1xf32>
    %cst_10 = arith.constant dense<0xFF800000> : vector<2x16xf32>
    %15 = vector.multi_reduction <maximumf>, %13, %cst_10 [2] : vector<2x16x16xf32> to vector<2x16xf32>
    %16 = vector.shape_cast %15 : vector<2x16xf32> to vector<2x16x1xf32>
    %17 = arith.maximumf %14, %16 : vector<2x16x1xf32>
    %18 = arith.subf %14, %17 : vector<2x16x1xf32>
    %19 = math.exp %18 : vector<2x16x1xf32>
    %20 = vector.broadcast %17 : vector<2x16x1xf32> to vector<2x16x16xf32>
    %21 = arith.subf %13, %20 : vector<2x16x16xf32>
    %22 = math.exp %21 : vector<2x16x16xf32>
    %c0_11 = arith.constant 0 : index
    %c0_12 = arith.constant 0 : index
    %c0_13 = arith.constant 0 : index
    %23 = vector.load %arg8[%c0_11, %c0_12, %c0_13] : memref<2x16x1xf32, #tpu.memory_space<vmem>>, vector<2x16x1xf32>
    %24 = arith.mulf %19, %23 : vector<2x16x1xf32>
    %cst_14 = arith.constant dense<0.000000e+00> : vector<2x16xf32>
    %25 = vector.multi_reduction <add>, %22, %cst_14 [2] : vector<2x16x16xf32> to vector<2x16xf32>
    %26 = vector.shape_cast %25 : vector<2x16xf32> to vector<2x16x1xf32>
    %27 = arith.addf %24, %26 : vector<2x16x1xf32>
    %c0_15 = arith.constant 0 : index
    %c0_16 = arith.constant 0 : index
    %c0_17 = arith.constant 0 : index
    %28 = vector.load %arg8[%c0_15, %c0_16, %c0_17] : memref<2x16x1xf32, #tpu.memory_space<vmem>>, vector<2x16x1xf32>
    tpu.vector_store %arg8[%c0_15, %c0_16, %c0_17], %27 {strides = array<i32>} : memref<2x16x1xf32, #tpu.memory_space<vmem>>, vector<2x16x1xf32>,
    %29 = arith.truncf %22 : vector<2x16x16xf32> to vector<2x16x16xbf16>
    %c0_18 = arith.constant 0 : index
    %c0_19 = arith.constant 0 : index
    %c0_20 = arith.constant 0 : index
    %30 = vector.load %arg5[%c0_18, %c0_19, %c0_20] : memref<2x16x16xbf16, #tpu.memory_space<vmem>>, vector<2x16x16xbf16>
    %cst_21 = arith.constant dense<0.000000e+00> : vector<2x16x16xf32>
    %31 = tpu.matmul %29, %30, %cst_21 {dimension_numbers = #tpu.dot_dimension_numbers<[2], [1], [1], [2], [0, 0, 0, 1, 1, 2], [0], [0]>} : vector<2x16x16xbf16>, vector<2x16x16xbf16>, vector<2x16x16xf32> -> vector<2x16x16xf32>
    %c0_22 = arith.constant 0 : index
    %c0_23 = arith.constant 0 : index
    %c0_24 = arith.constant 0 : index
    %32 = vector.load %arg9[%c0_22, %c0_23, %c0_24] : memref<2x16x16xf32, #tpu.memory_space<vmem>>, vector<2x16x16xf32>
    %33 = vector.broadcast %19 : vector<2x16x1xf32> to vector<2x16x16xf32>
    %34 = arith.mulf %33, %32 : vector<2x16x16xf32>
    %35 = arith.addf %34, %31 : vector<2x16x16xf32>
    %c0_25 = arith.constant 0 : index
    %c0_26 = arith.constant 0 : index
    %c0_27 = arith.constant 0 : index
    %36 = vector.load %arg9[%c0_25, %c0_26, %c0_27] : memref<2x16x16xf32, #tpu.memory_space<vmem>>, vector<2x16x16xf32>
    tpu.vector_store %arg9[%c0_25, %c0_26, %c0_27], %35 {strides = array<i32>} : memref<2x16x16xf32, #tpu.memory_space<vmem>>, vector<2x16x16xf32>,
    %c0_28 = arith.constant 0 : index
    %c0_29 = arith.constant 0 : index
    %c0_30 = arith.constant 0 : index
    %37 = vector.load %arg7[%c0_28, %c0_29, %c0_30] : memref<2x16x1xf32, #tpu.memory_space<vmem>>, vector<2x16x1xf32>
    tpu.vector_store %arg7[%c0_28, %c0_29, %c0_30], %17 {strides = array<i32>} : memref<2x16x1xf32, #tpu.memory_space<vmem>>, vector<2x16x1xf32>,
    %c0_i32_31 = arith.constant 0 : i32
    %38 = arith.cmpi eq, %arg2, %c0_i32_31 : i32
    %39 = arith.extui %38 : i1 to i32
    %c0_i32_32 = arith.constant 0 : i32
    %40 = arith.cmpi ne, %39, %c0_i32_32 : i32
    scf.if %40 {
      %c0_33 = arith.constant 0 : index
      %c0_34 = arith.constant 0 : index
      %c0_35 = arith.constant 0 : index
      %41 = vector.load %arg8[%c0_33, %c0_34, %c0_35] : memref<2x16x1xf32, #tpu.memory_space<vmem>>, vector<2x16x1xf32>
      %42 = tpu.reciprocal %41 {approx = true} : vector<2x16x1xf32> -> vector<2x16x1xf32>
      %c0_36 = arith.constant 0 : index
      %c0_37 = arith.constant 0 : index
      %c0_38 = arith.constant 0 : index
      %43 = vector.load %arg9[%c0_36, %c0_37, %c0_38] : memref<2x16x16xf32, #tpu.memory_space<vmem>>, vector<2x16x16xf32>
      %44 = vector.broadcast %42 : vector<2x16x1xf32> to vector<2x16x16xf32>
      %45 = arith.mulf %43, %44 : vector<2x16x16xf32>
      %46 = vector.extract_strided_slice %45 {offsets = [0, 0, 0], sizes = [1, 16, 16], strides = [1, 1, 1]} : vector<2x16x16xf32> to vector<1x16x16xf32>
      %47 = vector.shape_cast %46 : vector<1x16x16xf32> to vector<16x16xf32>
      %48 = arith.truncf %47 : vector<16x16xf32> to vector<16x16xbf16>
      %c0_39 = arith.constant 0 : index
      %c0_40 = arith.constant 0 : index
      %c0_41 = arith.constant 0 : index
      %49 = vector.load %arg6[%c0_39, %c0_40, %c0_41] : memref<1x16x32xbf16, #tpu.memory_space<vmem>>, vector<1x16x16xbf16>
      %50 = vector.shape_cast %49 : vector<1x16x16xbf16> to vector<16x16xbf16>
      %51 = vector.shape_cast %48 : vector<16x16xbf16> to vector<1x16x16xbf16>
      tpu.vector_store %arg6[%c0_39, %c0_40, %c0_41], %51 {strides = array<i32>} : memref<1x16x32xbf16, #tpu.memory_space<vmem>>, vector<1x16x16xbf16>,
      %52 = vector.extract_strided_slice %45 {offsets = [1, 0, 0], sizes = [1, 16, 16], strides = [1, 1, 1]} : vector<2x16x16xf32> to vector<1x16x16xf32>
      %53 = vector.shape_cast %52 : vector<1x16x16xf32> to vector<16x16xf32>
      %54 = arith.truncf %53 : vector<16x16xf32> to vector<16x16xbf16>
      %c0_42 = arith.constant 0 : index
      %c0_43 = arith.constant 0 : index
      %c16 = arith.constant 16 : index
      %55 = vector.load %arg6[%c0_42, %c0_43, %c16] : memref<1x16x32xbf16, #tpu.memory_space<vmem>>, vector<1x16x16xbf16>
      %56 = vector.shape_cast %55 : vector<1x16x16xbf16> to vector<16x16xbf16>
      %57 = vector.shape_cast %54 : vector<16x16xbf16> to vector<1x16x16xbf16>
      tpu.vector_store %arg6[%c0_42, %c0_43, %c16], %57 {strides = array<i32>} : memref<1x16x32xbf16, #tpu.memory_space<vmem>>, vector<1x16x16xbf16>,
    } else {
    }
    return
  }
  func.func @transform_0(%arg0: i32, %arg1: i32, %arg2: i32) -> (i32, i32, i32) {
    %c0_i32 = arith.constant 0 : i32
    %c0_i32_0 = arith.constant 0 : i32
    return %arg0, %arg1, %c0_i32 : i32, i32, i32
  }
  func.func @transform_1(%arg0: i32, %arg1: i32, %arg2: i32) -> (i32, i32, i32) {
    %c0_i32 = arith.constant 0 : i32
    %c0_i32_0 = arith.constant 0 : i32
    return %arg0, %arg2, %c0_i32 : i32, i32, i32
  }
  func.func @transform_2(%arg0: i32, %arg1: i32, %arg2: i32) -> (i32, i32, i32) {
    %c0_i32 = arith.constant 0 : i32
    %c0_i32_0 = arith.constant 0 : i32
    return %arg0, %arg2, %c0_i32 : i32, i32, i32
  }
  func.func @transform_3(%arg0: i32, %arg1: i32, %arg2: i32) -> (i32, i32, i32) {
    %c0_i32 = arith.constant 0 : i32
    %c0_i32_0 = arith.constant 0 : i32
    return %arg0, %arg1, %c0_i32 : i32, i32, i32
  }
}

module attributes {stable_mosaic.version = 11 : i64} {
  func.func @_ln_matmul_kernel(%arg0: i32, %arg1: i32, %arg2: memref<24x32xf32, #tpu.memory_space<vmem>>, %arg3: memref<1x32xf32, #tpu.memory_space<vmem>>, %arg4: memref<1x32xf32, #tpu.memory_space<vmem>>, %arg5: memref<32x128xbf16, #tpu.memory_space<vmem>>, %arg6: memref<1x128xf32, #tpu.memory_space<vmem>>, %arg7: memref<24x128xbf16, #tpu.memory_space<vmem>>, %arg8: memref<24x32xbf16, #tpu.memory_space<vmem>>) attributes {dimension_semantics = [#tpu.dimension_semantics<parallel>, #tpu.dimension_semantics<arbitrary>], iteration_bounds = array<i64: 1, 1>, scalar_prefetch = 0 : i64, scratch_operands = 1 : i64, tpu.core_type = #tpu.core_type<tc>, window_params = [{transform_indices = @transform_0, window_bounds = array<i64: 24, 32>}, {pipeline_mode = #tpu.pipeline_mode<synchronous>, transform_indices = @transform_1, window_bounds = array<i64: 1, 32>}, {pipeline_mode = #tpu.pipeline_mode<synchronous>, transform_indices = @transform_2, window_bounds = array<i64: 1, 32>}, {transform_indices = @transform_3, window_bounds = array<i64: 32, 128>}, {transform_indices = @transform_4, window_bounds = array<i64: 1, 128>}, {transform_indices = @transform_5, window_bounds = array<i64: 24, 128>}]} {
    %c0 = arith.constant 0 : index
    %c0_0 = arith.constant 0 : index
    %0 = vector.load %arg2[%c0, %c0_0] : memref<24x32xf32, #tpu.memory_space<vmem>>, vector<24x32xf32>
    %cst = arith.constant dense<0.000000e+00> : vector<24xf32>
    %1 = vector.multi_reduction <add>, %0, %cst [1] : vector<24x32xf32> to vector<24xf32>
    %2 = vector.shape_cast %1 : vector<24xf32> to vector<24x1xf32>
    %cst_1 = arith.constant 3.200000e+01 : f32
    %3 = vector.broadcast %cst_1 : f32 to vector<24x1xf32>
    %4 = arith.divf %2, %3 : vector<24x1xf32>
    %5 = vector.broadcast %4 : vector<24x1xf32> to vector<24x32xf32>
    %6 = arith.subf %0, %5 : vector<24x32xf32>
    %7 = arith.mulf %6, %6 : vector<24x32xf32>
    %cst_2 = arith.constant dense<0.000000e+00> : vector<24xf32>
    %8 = vector.multi_reduction <add>, %7, %cst_2 [1] : vector<24x32xf32> to vector<24xf32>
    %9 = vector.shape_cast %8 : vector<24xf32> to vector<24x1xf32>
    %cst_3 = arith.constant 3.200000e+01 : f32
    %10 = vector.broadcast %cst_3 : f32 to vector<24x1xf32>
    %11 = arith.divf %9, %10 : vector<24x1xf32>
    %12 = vector.broadcast %4 : vector<24x1xf32> to vector<24x32xf32>
    %13 = arith.subf %0, %12 : vector<24x32xf32>
    %cst_4 = arith.constant 9.99999974E-6 : f32
    %14 = vector.broadcast %cst_4 : f32 to vector<24x1xf32>
    %15 = arith.addf %11, %14 : vector<24x1xf32>
    %16 = math.rsqrt %15 : vector<24x1xf32>
    %17 = vector.broadcast %16 : vector<24x1xf32> to vector<24x32xf32>
    %18 = arith.mulf %13, %17 : vector<24x32xf32>
    %c0_5 = arith.constant 0 : index
    %c0_6 = arith.constant 0 : index
    %19 = vector.load %arg3[%c0_5, %c0_6] : memref<1x32xf32, #tpu.memory_space<vmem>>, vector<1x32xf32>
    %20 = vector.broadcast %19 : vector<1x32xf32> to vector<24x32xf32>
    %21 = arith.mulf %18, %20 : vector<24x32xf32>
    %c0_7 = arith.constant 0 : index
    %c0_8 = arith.constant 0 : index
    %22 = vector.load %arg4[%c0_7, %c0_8] : memref<1x32xf32, #tpu.memory_space<vmem>>, vector<1x32xf32>
    %23 = vector.broadcast %22 : vector<1x32xf32> to vector<24x32xf32>
    %24 = arith.addf %21, %23 : vector<24x32xf32>
    %25 = arith.truncf %24 : vector<24x32xf32> to vector<24x32xbf16>
    %c0_9 = arith.constant 0 : index
    %c0_10 = arith.constant 0 : index
    %26 = vector.load %arg5[%c0_9, %c0_10] : memref<32x128xbf16, #tpu.memory_space<vmem>>, vector<32x128xbf16>
    %cst_11 = arith.constant dense<0.000000e+00> : vector<24x128xf32>
    %27 = tpu.matmul %25, %26, %cst_11 {dimension_numbers = #tpu.dot_dimension_numbers<[1], [0], [0], [1], [0, 0, 1, 1], [], []>} : vector<24x32xbf16>, vector<32x128xbf16>, vector<24x128xf32> -> vector<24x128xf32>
    %c0_12 = arith.constant 0 : index
    %c0_13 = arith.constant 0 : index
    %28 = vector.load %arg6[%c0_12, %c0_13] : memref<1x128xf32, #tpu.memory_space<vmem>>, vector<1x128xf32>
    %29 = vector.broadcast %28 : vector<1x128xf32> to vector<24x128xf32>
    %30 = arith.addf %27, %29 : vector<24x128xf32>
    %cst_14 = arith.constant 1.702000e+00 : f32
    %31 = vector.broadcast %cst_14 : f32 to vector<24x128xf32>
    %32 = arith.mulf %31, %30 : vector<24x128xf32>
    %33 = arith.negf %32 : vector<24x128xf32>
    %34 = math.exp %33 : vector<24x128xf32>
    %cst_15 = arith.constant 1.000000e+00 : f32
    %35 = vector.broadcast %cst_15 : f32 to vector<24x128xf32>
    %36 = arith.addf %35, %34 : vector<24x128xf32>
    %37 = arith.divf %35, %36 : vector<24x128xf32>
    %38 = arith.mulf %30, %37 : vector<24x128xf32>
    %39 = arith.truncf %38 : vector<24x128xf32> to vector<24x128xbf16>
    %c0_16 = arith.constant 0 : index
    %c0_17 = arith.constant 0 : index
    %40 = vector.load %arg7[%c0_16, %c0_17] : memref<24x128xbf16, #tpu.memory_space<vmem>>, vector<24x128xbf16>
    tpu.vector_store %arg7[%c0_16, %c0_17], %39 {strides = array<i32>} : memref<24x128xbf16, #tpu.memory_space<vmem>>, vector<24x128xbf16>,
    return
  }
  func.func @transform_0(%arg0: i32, %arg1: i32) -> (i32, i32) {
    %c0_i32 = arith.constant 0 : i32
    %c0_i32_0 = arith.constant 0 : i32
    return %arg0, %c0_i32 : i32, i32
  }
  func.func @transform_1(%arg0: i32, %arg1: i32) -> (i32, i32) {
    %c0_i32 = arith.constant 0 : i32
    %c0_i32_0 = arith.constant 0 : i32
    %c0_i32_1 = arith.constant 0 : i32
    return %c0_i32, %c0_i32_0 : i32, i32
  }
  func.func @transform_2(%arg0: i32, %arg1: i32) -> (i32, i32) {
    %c0_i32 = arith.constant 0 : i32
    %c0_i32_0 = arith.constant 0 : i32
    %c0_i32_1 = arith.constant 0 : i32
    return %c0_i32, %c0_i32_0 : i32, i32
  }
  func.func @transform_3(%arg0: i32, %arg1: i32) -> (i32, i32) {
    %c0_i32 = arith.constant 0 : i32
    %c0_i32_0 = arith.constant 0 : i32
    return %c0_i32, %arg1 : i32, i32
  }
  func.func @transform_4(%arg0: i32, %arg1: i32) -> (i32, i32) {
    %c0_i32 = arith.constant 0 : i32
    %c0_i32_0 = arith.constant 0 : i32
    return %c0_i32, %arg1 : i32, i32
  }
  func.func @transform_5(%arg0: i32, %arg1: i32) -> (i32, i32) {
    %c0_i32 = arith.constant 0 : i32
    return %arg0, %arg1 : i32, i32
  }
}

module attributes {stable_mosaic.version = 11 : i64} {
  func.func @_matmul_res_kernel(%arg0: i32, %arg1: i32, %arg2: memref<24x32xbf16, #tpu.memory_space<vmem>>, %arg3: memref<32x128xbf16, #tpu.memory_space<vmem>>, %arg4: memref<1x128xf32, #tpu.memory_space<vmem>>, %arg5: memref<24x128xf32, #tpu.memory_space<vmem>>, %arg6: memref<24x128xf32, #tpu.memory_space<vmem>>) attributes {dimension_semantics = [#tpu.dimension_semantics<parallel>, #tpu.dimension_semantics<parallel>], iteration_bounds = array<i64: 1, 1>, scalar_prefetch = 0 : i64, scratch_operands = 0 : i64, tpu.core_type = #tpu.core_type<tc>, window_params = [{transform_indices = @transform_0, window_bounds = array<i64: 24, 32>}, {transform_indices = @transform_1, window_bounds = array<i64: 32, 128>}, {transform_indices = @transform_2, window_bounds = array<i64: 1, 128>}, {transform_indices = @transform_3, window_bounds = array<i64: 24, 128>}, {transform_indices = @transform_4, window_bounds = array<i64: 24, 128>}]} {
    %c0 = arith.constant 0 : index
    %c0_0 = arith.constant 0 : index
    %0 = vector.load %arg2[%c0, %c0_0] : memref<24x32xbf16, #tpu.memory_space<vmem>>, vector<24x32xbf16>
    %c0_1 = arith.constant 0 : index
    %c0_2 = arith.constant 0 : index
    %1 = vector.load %arg3[%c0_1, %c0_2] : memref<32x128xbf16, #tpu.memory_space<vmem>>, vector<32x128xbf16>
    %cst = arith.constant dense<0.000000e+00> : vector<24x128xf32>
    %2 = tpu.matmul %0, %1, %cst {dimension_numbers = #tpu.dot_dimension_numbers<[1], [0], [0], [1], [0, 0, 1, 1], [], []>} : vector<24x32xbf16>, vector<32x128xbf16>, vector<24x128xf32> -> vector<24x128xf32>
    %c0_3 = arith.constant 0 : index
    %c0_4 = arith.constant 0 : index
    %3 = vector.load %arg4[%c0_3, %c0_4] : memref<1x128xf32, #tpu.memory_space<vmem>>, vector<1x128xf32>
    %4 = vector.broadcast %3 : vector<1x128xf32> to vector<24x128xf32>
    %5 = arith.addf %2, %4 : vector<24x128xf32>
    %c0_5 = arith.constant 0 : index
    %c0_6 = arith.constant 0 : index
    %6 = vector.load %arg5[%c0_5, %c0_6] : memref<24x128xf32, #tpu.memory_space<vmem>>, vector<24x128xf32>
    %7 = arith.addf %5, %6 : vector<24x128xf32>
    %c0_7 = arith.constant 0 : index
    %c0_8 = arith.constant 0 : index
    %8 = vector.load %arg6[%c0_7, %c0_8] : memref<24x128xf32, #tpu.memory_space<vmem>>, vector<24x128xf32>
    tpu.vector_store %arg6[%c0_7, %c0_8], %7 {strides = array<i32>} : memref<24x128xf32, #tpu.memory_space<vmem>>, vector<24x128xf32>,
    return
  }
  func.func @transform_0(%arg0: i32, %arg1: i32) -> (i32, i32) {
    %c0_i32 = arith.constant 0 : i32
    %c0_i32_0 = arith.constant 0 : i32
    return %arg0, %c0_i32 : i32, i32
  }
  func.func @transform_1(%arg0: i32, %arg1: i32) -> (i32, i32) {
    %c0_i32 = arith.constant 0 : i32
    %c0_i32_0 = arith.constant 0 : i32
    return %c0_i32, %arg1 : i32, i32
  }
  func.func @transform_2(%arg0: i32, %arg1: i32) -> (i32, i32) {
    %c0_i32 = arith.constant 0 : i32
    %c0_i32_0 = arith.constant 0 : i32
    return %c0_i32, %arg1 : i32, i32
  }
  func.func @transform_3(%arg0: i32, %arg1: i32) -> (i32, i32) {
    %c0_i32 = arith.constant 0 : i32
    return %arg0, %arg1 : i32, i32
  }
  func.func @transform_4(%arg0: i32, %arg1: i32) -> (i32, i32) {
    %c0_i32 = arith.constant 0 : i32
    return %arg0, %arg1 : i32, i32
  }
}

module attributes {stable_mosaic.version = 11 : i64} {
  func.func @_matmul_res_kernel(%arg0: i32, %arg1: i32, %arg2: memref<24x128xbf16, #tpu.memory_space<vmem>>, %arg3: memref<128x128xbf16, #tpu.memory_space<vmem>>, %arg4: memref<1x128xf32, #tpu.memory_space<vmem>>, %arg5: memref<24x128xf32, #tpu.memory_space<vmem>>, %arg6: memref<24x128xf32, #tpu.memory_space<vmem>>) attributes {dimension_semantics = [#tpu.dimension_semantics<parallel>, #tpu.dimension_semantics<parallel>], iteration_bounds = array<i64: 1, 1>, scalar_prefetch = 0 : i64, scratch_operands = 0 : i64, tpu.core_type = #tpu.core_type<tc>, window_params = [{transform_indices = @transform_0, window_bounds = array<i64: 24, 128>}, {transform_indices = @transform_1, window_bounds = array<i64: 128, 128>}, {transform_indices = @transform_2, window_bounds = array<i64: 1, 128>}, {transform_indices = @transform_3, window_bounds = array<i64: 24, 128>}, {transform_indices = @transform_4, window_bounds = array<i64: 24, 128>}]} {
    %c0 = arith.constant 0 : index
    %c0_0 = arith.constant 0 : index
    %0 = vector.load %arg2[%c0, %c0_0] : memref<24x128xbf16, #tpu.memory_space<vmem>>, vector<24x128xbf16>
    %c0_1 = arith.constant 0 : index
    %c0_2 = arith.constant 0 : index
    %1 = vector.load %arg3[%c0_1, %c0_2] : memref<128x128xbf16, #tpu.memory_space<vmem>>, vector<128x128xbf16>
    %cst = arith.constant dense<0.000000e+00> : vector<24x128xf32>
    %2 = tpu.matmul %0, %1, %cst {dimension_numbers = #tpu.dot_dimension_numbers<[1], [0], [0], [1], [0, 0, 1, 1], [], []>} : vector<24x128xbf16>, vector<128x128xbf16>, vector<24x128xf32> -> vector<24x128xf32>
    %c0_3 = arith.constant 0 : index
    %c0_4 = arith.constant 0 : index
    %3 = vector.load %arg4[%c0_3, %c0_4] : memref<1x128xf32, #tpu.memory_space<vmem>>, vector<1x128xf32>
    %4 = vector.broadcast %3 : vector<1x128xf32> to vector<24x128xf32>
    %5 = arith.addf %2, %4 : vector<24x128xf32>
    %c0_5 = arith.constant 0 : index
    %c0_6 = arith.constant 0 : index
    %6 = vector.load %arg5[%c0_5, %c0_6] : memref<24x128xf32, #tpu.memory_space<vmem>>, vector<24x128xf32>
    %7 = arith.addf %5, %6 : vector<24x128xf32>
    %c0_7 = arith.constant 0 : index
    %c0_8 = arith.constant 0 : index
    %8 = vector.load %arg6[%c0_7, %c0_8] : memref<24x128xf32, #tpu.memory_space<vmem>>, vector<24x128xf32>
    tpu.vector_store %arg6[%c0_7, %c0_8], %7 {strides = array<i32>} : memref<24x128xf32, #tpu.memory_space<vmem>>, vector<24x128xf32>,
    return
  }
  func.func @transform_0(%arg0: i32, %arg1: i32) -> (i32, i32) {
    %c0_i32 = arith.constant 0 : i32
    %c0_i32_0 = arith.constant 0 : i32
    return %arg0, %c0_i32 : i32, i32
  }
  func.func @transform_1(%arg0: i32, %arg1: i32) -> (i32, i32) {
    %c0_i32 = arith.constant 0 : i32
    %c0_i32_0 = arith.constant 0 : i32
    return %c0_i32, %arg1 : i32, i32
  }
  func.func @transform_2(%arg0: i32, %arg1: i32) -> (i32, i32) {
    %c0_i32 = arith.constant 0 : i32
    %c0_i32_0 = arith.constant 0 : i32
    return %c0_i32, %arg1 : i32, i32
  }
  func.func @transform_3(%arg0: i32, %arg1: i32) -> (i32, i32) {
    %c0_i32 = arith.constant 0 : i32
    return %arg0, %arg1 : i32, i32
  }
  func.func @transform_4(%arg0: i32, %arg1: i32) -> (i32, i32) {
    %c0_i32 = arith.constant 0 : i32
    return %arg0, %arg1 : i32, i32
  }
}

module attributes {stable_mosaic.version = 11 : i64} {
  func.func @_ln_matmul_kernel(%arg0: i32, %arg1: i32, %arg2: memref<24x32xf32, #tpu.memory_space<vmem>>, %arg3: memref<1x32xf32, #tpu.memory_space<vmem>>, %arg4: memref<1x32xf32, #tpu.memory_space<vmem>>, %arg5: memref<32x128xbf16, #tpu.memory_space<vmem>>, %arg6: memref<1x128xf32, #tpu.memory_space<vmem>>, %arg7: memref<24x128xf32, #tpu.memory_space<vmem>>, %arg8: memref<24x32xbf16, #tpu.memory_space<vmem>>) attributes {dimension_semantics = [#tpu.dimension_semantics<parallel>, #tpu.dimension_semantics<arbitrary>], iteration_bounds = array<i64: 1, 1>, scalar_prefetch = 0 : i64, scratch_operands = 1 : i64, tpu.core_type = #tpu.core_type<tc>, window_params = [{transform_indices = @transform_0, window_bounds = array<i64: 24, 32>}, {pipeline_mode = #tpu.pipeline_mode<synchronous>, transform_indices = @transform_1, window_bounds = array<i64: 1, 32>}, {pipeline_mode = #tpu.pipeline_mode<synchronous>, transform_indices = @transform_2, window_bounds = array<i64: 1, 32>}, {transform_indices = @transform_3, window_bounds = array<i64: 32, 128>}, {transform_indices = @transform_4, window_bounds = array<i64: 1, 128>}, {transform_indices = @transform_5, window_bounds = array<i64: 24, 128>}]} {
    %c0 = arith.constant 0 : index
    %c0_0 = arith.constant 0 : index
    %0 = vector.load %arg2[%c0, %c0_0] : memref<24x32xf32, #tpu.memory_space<vmem>>, vector<24x32xf32>
    %cst = arith.constant dense<0.000000e+00> : vector<24xf32>
    %1 = vector.multi_reduction <add>, %0, %cst [1] : vector<24x32xf32> to vector<24xf32>
    %2 = vector.shape_cast %1 : vector<24xf32> to vector<24x1xf32>
    %cst_1 = arith.constant 3.200000e+01 : f32
    %3 = vector.broadcast %cst_1 : f32 to vector<24x1xf32>
    %4 = arith.divf %2, %3 : vector<24x1xf32>
    %5 = vector.broadcast %4 : vector<24x1xf32> to vector<24x32xf32>
    %6 = arith.subf %0, %5 : vector<24x32xf32>
    %7 = arith.mulf %6, %6 : vector<24x32xf32>
    %cst_2 = arith.constant dense<0.000000e+00> : vector<24xf32>
    %8 = vector.multi_reduction <add>, %7, %cst_2 [1] : vector<24x32xf32> to vector<24xf32>
    %9 = vector.shape_cast %8 : vector<24xf32> to vector<24x1xf32>
    %cst_3 = arith.constant 3.200000e+01 : f32
    %10 = vector.broadcast %cst_3 : f32 to vector<24x1xf32>
    %11 = arith.divf %9, %10 : vector<24x1xf32>
    %12 = vector.broadcast %4 : vector<24x1xf32> to vector<24x32xf32>
    %13 = arith.subf %0, %12 : vector<24x32xf32>
    %cst_4 = arith.constant 9.99999974E-6 : f32
    %14 = vector.broadcast %cst_4 : f32 to vector<24x1xf32>
    %15 = arith.addf %11, %14 : vector<24x1xf32>
    %16 = math.rsqrt %15 : vector<24x1xf32>
    %17 = vector.broadcast %16 : vector<24x1xf32> to vector<24x32xf32>
    %18 = arith.mulf %13, %17 : vector<24x32xf32>
    %c0_5 = arith.constant 0 : index
    %c0_6 = arith.constant 0 : index
    %19 = vector.load %arg3[%c0_5, %c0_6] : memref<1x32xf32, #tpu.memory_space<vmem>>, vector<1x32xf32>
    %20 = vector.broadcast %19 : vector<1x32xf32> to vector<24x32xf32>
    %21 = arith.mulf %18, %20 : vector<24x32xf32>
    %c0_7 = arith.constant 0 : index
    %c0_8 = arith.constant 0 : index
    %22 = vector.load %arg4[%c0_7, %c0_8] : memref<1x32xf32, #tpu.memory_space<vmem>>, vector<1x32xf32>
    %23 = vector.broadcast %22 : vector<1x32xf32> to vector<24x32xf32>
    %24 = arith.addf %21, %23 : vector<24x32xf32>
    %25 = arith.truncf %24 : vector<24x32xf32> to vector<24x32xbf16>
    %c0_9 = arith.constant 0 : index
    %c0_10 = arith.constant 0 : index
    %26 = vector.load %arg5[%c0_9, %c0_10] : memref<32x128xbf16, #tpu.memory_space<vmem>>, vector<32x128xbf16>
    %cst_11 = arith.constant dense<0.000000e+00> : vector<24x128xf32>
    %27 = tpu.matmul %25, %26, %cst_11 {dimension_numbers = #tpu.dot_dimension_numbers<[1], [0], [0], [1], [0, 0, 1, 1], [], []>} : vector<24x32xbf16>, vector<32x128xbf16>, vector<24x128xf32> -> vector<24x128xf32>
    %c0_12 = arith.constant 0 : index
    %c0_13 = arith.constant 0 : index
    %28 = vector.load %arg6[%c0_12, %c0_13] : memref<1x128xf32, #tpu.memory_space<vmem>>, vector<1x128xf32>
    %29 = vector.broadcast %28 : vector<1x128xf32> to vector<24x128xf32>
    %30 = arith.addf %27, %29 : vector<24x128xf32>
    %c0_14 = arith.constant 0 : index
    %c0_15 = arith.constant 0 : index
    %31 = vector.load %arg7[%c0_14, %c0_15] : memref<24x128xf32, #tpu.memory_space<vmem>>, vector<24x128xf32>
    tpu.vector_store %arg7[%c0_14, %c0_15], %30 {strides = array<i32>} : memref<24x128xf32, #tpu.memory_space<vmem>>, vector<24x128xf32>,
    return
  }
  func.func @transform_0(%arg0: i32, %arg1: i32) -> (i32, i32) {
    %c0_i32 = arith.constant 0 : i32
    %c0_i32_0 = arith.constant 0 : i32
    return %arg0, %c0_i32 : i32, i32
  }
  func.func @transform_1(%arg0: i32, %arg1: i32) -> (i32, i32) {
    %c0_i32 = arith.constant 0 : i32
    %c0_i32_0 = arith.constant 0 : i32
    %c0_i32_1 = arith.constant 0 : i32
    return %c0_i32, %c0_i32_0 : i32, i32
  }
  func.func @transform_2(%arg0: i32, %arg1: i32) -> (i32, i32) {
    %c0_i32 = arith.constant 0 : i32
    %c0_i32_0 = arith.constant 0 : i32
    %c0_i32_1 = arith.constant 0 : i32
    return %c0_i32, %c0_i32_0 : i32, i32
  }
  func.func @transform_3(%arg0: i32, %arg1: i32) -> (i32, i32) {
    %c0_i32 = arith.constant 0 : i32
    %c0_i32_0 = arith.constant 0 : i32
    return %c0_i32, %arg1 : i32, i32
  }
  func.func @transform_4(%arg0: i32, %arg1: i32) -> (i32, i32) {
    %c0_i32 = arith.constant 0 : i32
    %c0_i32_0 = arith.constant 0 : i32
    return %c0_i32, %arg1 : i32, i32
  }
  func.func @transform_5(%arg0: i32, %arg1: i32) -> (i32, i32) {
    %c0_i32 = arith.constant 0 : i32
    return %arg0, %arg1 : i32, i32
  }
}

</mosaic_0001>

<bundles_post_ra>
// kernel: tc_vision_transformer_forward.14
= control target key start
LH: loop header
LB: loop body
LE: loop exit
PB: predicated region body
PF: predicated region fallthrough
CT: control target
= control target key end

     0   :  { %vm17_vm0 = vcmask 261120   ;;  %s146_s0 = inlined_call_operand.vmem [shape: f32[24,32], index: 0, kind: input, shape index: {}]   ;;  %s147_s1 = inlined_call_operand.vmem [shape: f32[1,32], index: 1, kind: input, shape index: {}]   ;;  %s148_s2 = inlined_call_operand.vmem [shape: f32[1,32], index: 2, kind: input, shape index: {}]   ;;  %s149_s3 = inlined_call_operand.vmem [shape: f32[24,32], index: 3, kind: output, shape index: {}]  }
   0x1   :  { %v14_v0 = vld [vmem:[%s146_s0] sm:$0xff]  ;;  %v16_v1 = vld [vmem:[%s146_s0 + $0x10] sm:$0xff]  ;;  %v15_v2 = vld [vmem:[%s146_s0 + $0x8] sm:$0xff] }
   0x2   :  { %v18_v3 = vsel %vm17_vm0, %v14_v0, 0.0  ;;  %v24_v4 = vsel %vm17_vm0, %v16_v1, 0.0  ;;  %v21_v5 = vsel %vm17_vm0, %v15_v2, 0.0  ;;  %v85_v31 = vld [vmem:[%s147_s1] ss:$0 sm:$0xff] }
   0x3   :  { %19 = vadd.xlane.f32.xlu0 %v18_v3  ;;  %25 = vadd.xlane.f32.xlu1 %v24_v4  ;;  %v86_v33 = vld [vmem:[%s148_s2] ss:$0 sm:$0xff] }
   0x7   :  { %22 = vadd.xlane.f32.xlu0 %v21_v5 }
  0x90   :  { %v20_v6 = vpop.xlane.xlu0 %19  ;;  %v26_v7 = vpop.xlane.xlu1 %25 }
  0x91   :  { %v28_v8 = vmul.f32 0.03125, %v20_v6  ;;  %v30_v9 = vmul.f32 0.03125, %v26_v7 }
  0x93   :  { %v31_v10 = vsub.f32 %v14_v0, %v28_v8  ;;  %v33_v11 = vsub.f32 %v16_v1, %v30_v9 }
  0x94   :  { %v23_v12 = vpop.xlane.xlu0 %22 }
  0x95   :  { %v29_v13 = vmul.f32 0.03125, %v23_v12  ;;  %v34_v14 = vmul.f32 %v31_v10, %v31_v10  ;;  %v36_v15 = vmul.f32 %v33_v11, %v33_v11 }
  0x97   :  { %v32_v16 = vsub.f32 %v15_v2, %v29_v13  ;;  %v37_v17 = vsel %vm17_vm0, %v34_v14, 0.0  ;;  %v43_v18 = vsel %vm17_vm0, %v36_v15, 0.0 }
  0x98   :  { %38 = vadd.xlane.f32.xlu1 %v37_v17 }
  0x99   :  { %v35_v19 = vmul.f32 %v32_v16, %v32_v16 }
  0x9b   :  { %v40_v20 = vsel %vm17_vm0, %v35_v19, 0.0 }
  0x9c   :  { %44 = vadd.xlane.f32.xlu1 %v43_v18  ;;  %41 = vadd.xlane.f32.xlu0 %v40_v20 }
 0x125   :  { %v39_v21 = vpop.xlane.xlu1 %38 }
 0x126   :  { %v46_v22 = vmul.f32 0.03125, %v39_v21 }
 0x128   :  { %v49_v23 = vadd.f32 1e-05, %v46_v22 }
 0x129   :  { %v45_v24 = vpop.xlane.xlu1 %44  ;;  %v42_v25 = vpop.xlane.xlu0 %41 }
 0x12a   :  { %87 = vrsqrt.f32 %v49_v23  ;;  %v48_v26 = vmul.f32 0.03125, %v45_v24  ;;  %v47_v27 = vmul.f32 0.03125, %v42_v25 }
 0x12c   :  { %v51_v28 = vadd.f32 1e-05, %v48_v26  ;;  %v50_v29 = vadd.f32 1e-05, %v47_v27 }
 0x12e   :  { %89 = vrsqrt.f32 %v51_v28 }
 0x12f   :  { %91 = vrsqrt.f32 %v50_v29 }
 0x134   :  { %v88_v30 = vpop.eup %87 }
 0x135   :  { %v55_v32 = vmul.f32 %v88_v30, %v31_v10 }
 0x137   :  { %v65_v34 = vmul.f32 %v85_v31, %v55_v32 }
 0x138   :  { %v90_v35 = vpop.eup %89 }
 0x139   :  { %v92_v36 = vpop.eup %91  ;;  %v75_v37 = vadd.f32 %v86_v33, %v65_v34  ;;  %v57_v38 = vmul.f32 %v90_v35, %v33_v11 }
 0x13a   :  { %v56_v39 = vmul.f32 %v92_v36, %v32_v16 }
 0x13b   :  { %78 = vst.msk [vmem:[%s149_s3] sm:$0xff] %vm17_vm0, %v75_v37  ;;  %v67_v40 = vmul.f32 %v85_v31, %v57_v38 }
 0x13c   :  { %v66_v41 = vmul.f32 %v85_v31, %v56_v39 }
 0x13d   :  { %v77_v42 = vadd.f32 %v86_v33, %v67_v40 }
 0x13e   :  { %v76_v43 = vadd.f32 %v86_v33, %v66_v41 }
 0x13f   :  { %80 = vst.msk [vmem:[%s149_s3 + $0x10] sm:$0xff] %vm17_vm0, %v77_v42 }
 0x140   :  { %79 = vst.msk [vmem:[%s149_s3 + $0x8] sm:$0xff] %vm17_vm0, %v76_v43 }

// kernel: tc_vision_transformer_forward.13
= control target key start
LH: loop header
LB: loop body
LE: loop exit
PB: predicated region body
PF: predicated region fallthrough
CT: control target
= control target key end

     0   :  { %v212_v0 = vmov 0   ;;  %vm129_vm0 = vcmask 523264   ;;  %s284_s1 = inlined_call_operand.vmem [shape: bf16[192,128], index: 1, kind: input, shape index: {}]   ;;  %s285_s0 = inlined_call_operand.vmem [shape: bf16[16,192], index: 0, kind: input, shape index: {}]   ;;  %s286_s2 = inlined_call_operand.vmem [shape: f32[1,128], index: 2, kind: input, shape index: {}]   ;;  %s287_s3 = inlined_call_operand.vmem [shape: f32[16,128], index: 3, kind: output, shape index: {}]  }
   0x1   :  { %133 = vmatprep.subr.bf16.mxu0 %v212_v0  ;;  %v197_v1 = vld [vmem:[%s284_s1] sm:$0xff]   ;;  %v198_v2 = vld [vmem:[%s284_s1 + $0x8] sm:$0xff]   ;;  %v199_v3 = vld [vmem:[%s284_s1 + $0x10] sm:$0xff]  }
   0x2   :  { %134 = vmatpush1.bf16.msra.mxu0 %v197_v1  ;;  %v200_v4 = vld [vmem:[%s284_s1 + $0x18] sm:$0xff]   ;;  %v211_v5 = vld [vmem:[%s285_s0 + $0x4] ss:$8 sps:$4 sm:$0xff]   ;;  %v203_v8 = vld [vmem:[%s284_s1 + $0x30] sm:$0xff]  }
   0x3   :  { %135 = vmatprep.subr.bf16.mxu0 %v212_v0  ;;  %v201_v6 = vld [vmem:[%s284_s1 + $0x20] sm:$0xff]   ;;  %195 = vmatprep.mubr.msk.bf16.mxu0 %vm129_vm0, %v211_v5  ;;  %v202_v7 = vld [vmem:[%s284_s1 + $0x28] sm:$0xff]   ;;  %v204_v9 = vld [vmem:[%s284_s1 + $0x38] sm:$0xff]  }
   0x4   :  { %v205_v10 = vld [vmem:[%s284_s1 + $0x40] sm:$0xff]   ;;  %v206_v11 = vld [vmem:[%s284_s1 + $0x48] sm:$0xff]   ;;  %v207_v12 = vld [vmem:[%s284_s1 + $0x50] sm:$0xff]  }
   0x5   :  { %v208_v13 = vld [vmem:[%s284_s1 + $0x58] sm:$0xff]   ;;  %v209_v14 = vld [vmem:[%s285_s0] ss:$8 sps:$4 sm:$0xff]  }
   0x6   :  { %136 = vmatpush1.bf16.msra.mxu0 %v198_v2  ;;  %v180_v15 = vld [vmem:[%s286_s2] ss:$0 sm:$0xff] }
   0x7   :  { %137 = vmatprep.subr.bf16.mxu0 %v212_v0 }
   0xa   :  { %138 = vmatpush1.bf16.msra.mxu0 %v199_v3 }
   0xb   :  { %139 = vmatprep.subr.bf16.mxu0 %v212_v0 }
   0xe   :  { %140 = vmatpush1.bf16.msra.mxu0 %v200_v4 }
   0xf   :  { %141 = vmatprep.subr.bf16.mxu0 %v212_v0 }
  0x12   :  { %142 = vmatpush1.bf16.msra.mxu0 %v201_v6 }
  0x13   :  { %143 = vmatprep.subr.bf16.mxu0 %v212_v0 }
  0x16   :  { %144 = vmatpush1.bf16.msra.mxu0 %v202_v7 }
  0x17   :  { %145 = vmatprep.subr.bf16.mxu0 %v212_v0 }
  0x1a   :  { %146 = vmatpush1.bf16.msra.mxu0 %v203_v8 }
  0x1b   :  { %147 = vmatprep.subr.bf16.mxu0 %v212_v0 }
  0x1e   :  { %148 = vmatpush1.bf16.msra.mxu0 %v204_v9 }
  0x1f   :  { %149 = vmatprep.subr.bf16.mxu0 %v212_v0 }
  0x22   :  { %150 = vmatpush1.bf16.msra.mxu0 %v205_v10 }
  0x23   :  { %151 = vmatprep.subr.bf16.mxu0 %v212_v0 }
  0x26   :  { %152 = vmatpush1.bf16.msra.mxu0 %v206_v11 }
  0x27   :  { %153 = vmatprep.subr.bf16.mxu0 %v212_v0 }
  0x2a   :  { %154 = vmatpush1.bf16.msra.mxu0 %v207_v12 }
  0x2b   :  { %155 = vmatprep.subr.bf16.mxu0 %v212_v0 }
  0x2e   :  { %156 = vmatpush1.bf16.msra.mxu0 %v208_v13 }
  0x31   :  { %166 = vmatmul.mubr.bf16.vlgmr.msra.gmra.mrb[0].mxu0 %v209_v14 }
 0x104   :  { %v167_v16 = vpop.f32.mrb[0].mxu0 }
 0x105   :  { %v168_v17 = vadd.f32 %v180_v15, %v167_v16  ;;  %v169_v18 = vpop.f32.mrb[1].mxu0 }
 0x106   :  { %v170_v19 = vpop.f32.mrb[2].mxu0 }
 0x107   :  { %174 = vst [vmem:[%s287_s3] sm:$0xff] %v168_v17  ;;  %v171_v20 = vadd.f32 %v180_v15, %v170_v19  ;;  %v172_v21 = vpop.f32.mrb[3].mxu0 }
 0x109   :  { %175 = vst [vmem:[%s287_s3 + $0x8] sm:$0xff] %v171_v20 }

// kernel: tc_vision_transformer_forward.15
= control target key start
LH: loop header
LB: loop body
LE: loop exit
PB: predicated region body
PF: predicated region fallthrough
CT: control target
= control target key end

     0   :  { %vm24_vm0 = vcmask 261120   ;;  %s290_s0 = inlined_call_operand.vmem [shape: f32[24,32], index: 0, kind: input, shape index: {}]   ;;  %s291_s3 = inlined_call_operand.vmem [shape: bf16[32,128], index: 3, kind: input, shape index: {}]   ;;  %s292_s1 = inlined_call_operand.vmem [shape: f32[1,32], index: 1, kind: input, shape index: {}]   ;;  %s293_s2 = inlined_call_operand.vmem [shape: f32[1,32], index: 2, kind: input, shape index: {}]   ;;  %s294_s4 = inlined_call_operand.vmem [shape: f32[1,128], index: 4, kind: input, shape index: {}]   ;;  %s295_s5 = inlined_call_operand.vmem [shape: bf16[24,128], index: 5, kind: output, shape index: {}]  }
   0x1   :  { %v21_v0 = vld [vmem:[%s290_s0] sm:$0xff]  ;;  %v23_v1 = vld [vmem:[%s290_s0 + $0x10] sm:$0xff]  ;;  %v22_v2 = vld [vmem:[%s290_s0 + $0x8] sm:$0xff] }
   0x2   :  { %v25_v3 = vsel %vm24_vm0, %v21_v0, 0.0  ;;  %v31_v4 = vsel %vm24_vm0, %v23_v1, 0.0  ;;  %v28_v5 = vsel %vm24_vm0, %v22_v2, 0.0  ;;  %v214_v21 = vld [vmem:[%s291_s3] sm:$0xff]   ;;  %v215_v22 = vld [vmem:[%s291_s3 + $0x8] sm:$0xff]  }
   0x3   :  { %26 = vadd.xlane.f32.xlu0 %v25_v3  ;;  %32 = vadd.xlane.f32.xlu1 %v31_v4  ;;  %v184_v34 = vld [vmem:[%s292_s1] ss:$0 sm:$0xff] }
   0x4   :  { %206 = vmatprep.subr.bf16.mxu0 %v214_v21  ;;  %v185_v40 = vld [vmem:[%s293_s2] ss:$0 sm:$0xff] }
   0x5   :  { %207 = vmatpush3.bf16.msra.mxu0 %v214_v21  ;;  %v186_v48 = vld [vmem:[%s294_s4] ss:$0 sm:$0xff] }
   0x6   :  { %208 = vmatprep.subr.bf16.mxu0 %v215_v22 }
   0x7   :  { %29 = vadd.xlane.f32.xlu0 %v28_v5 }
   0x9   :  { %209 = vmatpush3.bf16.msra.mxu0 %v215_v22 }
  0x90   :  { %v27_v6 = vpop.xlane.xlu0 %26  ;;  %v33_v7 = vpop.xlane.xlu1 %32 }
  0x91   :  { %v35_v8 = vmul.f32 0.03125, %v27_v6  ;;  %v37_v9 = vmul.f32 0.03125, %v33_v7 }
  0x93   :  { %v38_v10 = vsub.f32 %v21_v0, %v35_v8  ;;  %v40_v11 = vsub.f32 %v23_v1, %v37_v9 }
  0x94   :  { %v30_v12 = vpop.xlane.xlu0 %29 }
  0x95   :  { %v36_v13 = vmul.f32 0.03125, %v30_v12  ;;  %v41_v14 = vmul.f32 %v38_v10, %v38_v10  ;;  %v43_v15 = vmul.f32 %v40_v11, %v40_v11 }
  0x97   :  { %v39_v16 = vsub.f32 %v22_v2, %v36_v13  ;;  %v44_v17 = vsel %vm24_vm0, %v41_v14, 0.0  ;;  %v50_v18 = vsel %vm24_vm0, %v43_v15, 0.0 }
  0x98   :  { %45 = vadd.xlane.f32.xlu1 %v44_v17 }
  0x99   :  { %v42_v19 = vmul.f32 %v39_v16, %v39_v16 }
  0x9b   :  { %v47_v20 = vsel %vm24_vm0, %v42_v19, 0.0 }
  0x9c   :  { %51 = vadd.xlane.f32.xlu1 %v50_v18  ;;  %48 = vadd.xlane.f32.xlu0 %v47_v20 }
 0x125   :  { %v46_v23 = vpop.xlane.xlu1 %45 }
 0x126   :  { %v53_v24 = vmul.f32 0.03125, %v46_v23 }
 0x128   :  { %v56_v25 = vadd.f32 1e-05, %v53_v24 }
 0x129   :  { %v52_v26 = vpop.xlane.xlu1 %51  ;;  %v49_v27 = vpop.xlane.xlu0 %48 }
 0x12a   :  { %216 = vrsqrt.f32 %v56_v25  ;;  %v55_v28 = vmul.f32 0.03125, %v52_v26  ;;  %v54_v29 = vmul.f32 0.03125, %v49_v27 }
 0x12c   :  { %v58_v30 = vadd.f32 1e-05, %v55_v28  ;;  %v57_v31 = vadd.f32 1e-05, %v54_v29 }
 0x12e   :  { %218 = vrsqrt.f32 %v58_v30 }
 0x12f   :  { %220 = vrsqrt.f32 %v57_v31 }
 0x134   :  { %v217_v32 = vpop.eup %216 }
 0x135   :  { %v62_v33 = vmul.f32 %v217_v32, %v38_v10 }
 0x137   :  { %v72_v39 = vmul.f32 %v184_v34, %v62_v33 }
 0x138   :  { %v219_v35 = vpop.eup %218 }
 0x139   :  { %v221_v36 = vpop.eup %220  ;;  %v64_v37 = vmul.f32 %v219_v35, %v40_v11  ;;  %v82_v44 = vadd.f32 %v185_v40, %v72_v39 }
 0x13a   :  { %v63_v38 = vmul.f32 %v221_v36, %v39_v16 }
 0x13b   :  { %v74_v41 = vmul.f32 %v184_v34, %v64_v37 }
 0x13c   :  { %v73_v42 = vmul.f32 %v184_v34, %v63_v38 }
 0x13d   :  { %v84_v43 = vadd.f32 %v185_v40, %v74_v41 }
 0x13e   :  { %v83_v45 = vadd.f32 %v185_v40, %v73_v42 }
 0x13f   :  { %v86_v46 = vpack.c.bf16 %v84_v43, %v84_v43 }
 0x140   :  { %v85_v47 = vpack.c.bf16 %v83_v45, %v82_v44 }
 0x142   :  { %210 = vmatprep.mubr.msk.bf16.mxu0 %vm24_vm0, %v85_v47 }
 0x143   :  { %211 = vmatmul.mubr.msk.bf16.vlgmr.msra.gmra.mrb[0].mxu0 %vm24_vm0, %v86_v46 }
 0x216   :  { %v212_v49 = vpop.f32.mrb[0].mxu0 }
 0x217   :  { %v159_v50 = vadd.f32 %v212_v49, %v186_v48  ;;  %v150_v51 = vpop.f32.mrb[1].mxu0 }
 0x218   :  { %v213_v52 = vpop.f32.mrb[2].mxu0  ;;  %v151_v55 = vadd.f32 %v186_v48, %v150_v51 }
 0x219   :  { %v196_v53 = vpack.c.bf16 %v159_v50, %v159_v50  ;;  %v153_v54 = vpop.f32.mrb[3].mxu0 }
 0x21a   :  { %v154_v56 = vadd.f32 %v186_v48, %v153_v54 }
 0x21b   :  { %179 = vst [vmem:[%s295_s5 + $0x8] sm:$0xf] %v196_v53 }
 0x21c   :  { %v200_v57 = vpack.c.bf16 %v154_v56, %v151_v55 }
 0x21e   :  { %201 = vst [vmem:[%s295_s5] sm:$0xff] %v200_v57  }

// kernel: tc_vision_transformer_forward.17
= control target key start
LH: loop header
LB: loop body
LE: loop exit
PB: predicated region body
PF: predicated region fallthrough
CT: control target
= control target key end

     0   :  { %vm52_vm0 = vcmask 261120   ;;  %s201_s1 = inlined_call_operand.vmem [shape: bf16[32,128], index: 1, kind: input, shape index: {}]   ;;  %s202_s0 = inlined_call_operand.vmem [shape: bf16[24,32], index: 0, kind: input, shape index: {}]   ;;  %s203_s2 = inlined_call_operand.vmem [shape: f32[1,128], index: 2, kind: input, shape index: {}]   ;;  %s204_s3 = inlined_call_operand.vmem [shape: f32[24,128], index: 3, kind: input, shape index: {}]   ;;  %s205_s4 = inlined_call_operand.vmem [shape: f32[24,128], index: 4, kind: output, shape index: {}]  }
   0x1   :  { %v139_v0 = vld [vmem:[%s201_s1] sm:$0xff]   ;;  %v140_v1 = vld [vmem:[%s201_s1 + $0x8] sm:$0xff]   ;;  %v109_v6 = vld [vmem:[%s204_s3 + $0x10] sm:$0xff] }
   0x2   :  { %131 = vmatprep.subr.bf16.mxu0 %v139_v0  ;;  %v141_v2 = vld [vmem:[%s202_s0] sm:$0xff]   ;;  %v142_v3 = vld [vmem:[%s202_s0 + $0x8] ss:$0 sps:$4 sm:$0xff]  }
   0x3   :  { %132 = vmatpush3.bf16.msra.mxu0 %v139_v0  ;;  %135 = vmatprep.mubr.msk.bf16.mxu0 %vm52_vm0, %v141_v2  ;;  %v120_v4 = vld [vmem:[%s203_s2] ss:$0 sm:$0xff]  ;;  %v108_v14 = vld [vmem:[%s204_s3 + $0x8] sm:$0xff] }
   0x4   :  { %133 = vmatprep.subr.bf16.mxu0 %v140_v1  ;;  %v107_v9 = vld [vmem:[%s204_s3] sm:$0xff] }
   0x7   :  { %134 = vmatpush3.bf16.msra.mxu0 %v140_v1 }
   0xa   :  { %136 = vmatmul.mubr.msk.bf16.vlgmr.msra.gmra.mrb[0].mxu0 %vm52_vm0, %v142_v3 }
  0xdd   :  { %v137_v5 = vpop.f32.mrb[0].mxu0 }
  0xde   :  { %v102_v7 = vadd.f32 %v137_v5, %v120_v4  ;;  %v93_v8 = vpop.f32.mrb[1].mxu0 }
  0xdf   :  { %v94_v10 = vadd.f32 %v120_v4, %v93_v8  ;;  %v138_v11 = vpop.f32.mrb[2].mxu0 }
  0xe0   :  { %v112_v12 = vadd.f32 %v109_v6, %v102_v7  ;;  %v96_v13 = vpop.f32.mrb[3].mxu0 }
  0xe1   :  { %v110_v15 = vadd.f32 %v107_v9, %v94_v10  ;;  %v97_v16 = vadd.f32 %v120_v4, %v96_v13 }
  0xe2   :  { %115 = vst [vmem:[%s205_s4 + $0x10] sm:$0xff] %v112_v12 }
  0xe3   :  { %113 = vst [vmem:[%s205_s4] sm:$0xff] %v110_v15  ;;  %v111_v17 = vadd.f32 %v108_v14, %v97_v16 }
  0xe5   :  { %114 = vst [vmem:[%s205_s4 + $0x8] sm:$0xff] %v111_v17 }

// kernel: tc_vision_transformer_forward.16
= control target key start
LH: loop header
LB: loop body
LE: loop exit
PB: predicated region body
PF: predicated region fallthrough
CT: control target
= control target key end

     0   :  { %s1068_s12 = smov 0   ;;  %s1070_s13 = smov 0   ;;  %s1167_s0 = inlined_call_operand.vmem [shape: bf16[4,16,16], index: 0, kind: input, shape index: {}]   ;;  %s1168_s1 = inlined_call_operand.vmem [shape: bf16[4,16,16], index: 1, kind: input, shape index: {}]   ;;  %s1169_s2 = inlined_call_operand.vmem [shape: bf16[4,16,16], index: 2, kind: input, shape index: {}]   ;;  %s1170_s3 = inlined_call_operand.vmem [shape: bf16[2,16,32], index: 3, kind: output, shape index: {}]  }
   0x1   :  { %s1072_s14 = smov 0  }
   0x2 LB: > { %s32_s15 = sadd.s32 1, %s1037_s13  ;;  %p890_p0 = scmp.ge.s32.totalorder %s1041_s14, 1  ;;  %s1041_s14 = sphi %s1072_s14, %s13_s14   ;;  %s1037_s13 = sphi %s1070_s13, %s1172_s13   ;;  %s1033_s12 = sphi %s1068_s12, %s1171_s12  }
   0x3   : > { %p34_p1 = scmp.ge.s32.totalorder %s32_s15, 2  ;;  %p205_p2 = scmp.lt.s32.totalorder %s1041_s14, 3 }
   0x5   : > { %s1174_s15 = smov (%p34_p1, %s32_s15), 0  ;;  %p206_p3 = pnand %p890_p0, %p205_p2 }
   0x6   : > { %s891_s16 = sshll.u32 (!%p206_p3), %s1033_s12, 1  ;;  %vm318_vm0 = vcmask (!%p206_p3), 130048   ;;  %v1043_v0 = vmov (!%p206_p3), 0.0   ;;  %vm1044_vm1 = vmmov (!%p206_p3), 0   ;;  %vm309_vm2 = vcmask (!%p206_p3), 7168   ;;  %s1047_s27 = smov (!%p206_p3), 16  }
   0x7   : > { %209 = sbr.rel (%p206_p3) target bundleno = 943 (0x3af), region = 32  ;;  %940 = vmatprep.subr.bf16.mxu1 (!%p206_p3), %v1043_v0  ;;  %p260_p4 = scmp.lt.s32.totalorder (!%p206_p3), %s891_s16, 3  ;;  %319 = vst.msk [vmem:[#allocation4] sm:$0xff] (!%p206_p3), %vm318_vm0, %v1043_v0  ;;  %320 = vst.msk [vmem:[#allocation4 + $0x8] sm:$0xff] (!%p206_p3), %vm318_vm0, %v1043_v0  ;;  %942 = vmatprep.mubr.msk.bf16.mxu1 (!%p206_p3), %vm1044_vm1, %v1043_v0  ;;  %v1045_v7 = vmov (!%p206_p3), -1e+30   ;;  %v447_v8 = vlaneseq (!%p206_p3) }
   0x8   : > { %321 = vst.msk [vmem:[#allocation4 + $0x10] sm:$0xff] (!%p206_p3), %vm318_vm0, %v1043_v0  ;;  %322 = vst.msk [vmem:[#allocation4 + $0x18] sm:$0xff] (!%p206_p3), %vm318_vm0, %v1043_v0  ;;  %934 = vmatprep.subr.bf16.mxu0 (!%p206_p3), %v1043_v0  ;;  %936 = vmatprep.mubr.msk.bf16.mxu0 (!%p206_p3), %vm1044_vm1, %v1043_v0  ;;  %v1046_v26 = vmov (!%p206_p3), 0   ;;  %p295_p5 = scmp.lt.s32.totalorder (!%p206_p3), %s1033_s12, 1  ;;  %vm742_vm4 = vcmask (!%p206_p3), 125952   ;;  %vm757_vm5 = vcmask (!%p206_p3), 257152  }
   0x9   : > { %312 = vst.msk [vmem:[#allocation2 + $0x10] sm:$0xff] (!%p206_p3), %vm309_vm2, %v1045_v7  ;;  %310 = vst.msk [vmem:[#allocation2] sm:$0xff] (!%p206_p3), %vm309_vm2, %v1045_v7  ;;  %v448_v9 = vand.u32 (!%p206_p3), 127, %v447_v8  ;;  %987 = vset.pattern.permute.xlu0 (!%p206_p3), %v1046_v26  ;;  %988 = vset.pattern.permute.xlu1 (!%p206_p3), %v1046_v26 }
   0xa   : > { %311 = vst.msk [vmem:[#allocation2 + $0x8] sm:$0xff] (!%p206_p3), %vm309_vm2, %v1045_v7  ;;  %313 = vst.msk [vmem:[#allocation2 + $0x18] sm:$0xff] (!%p206_p3), %vm309_vm2, %v1045_v7 }
   0xb   : > { %314 = vst.msk [vmem:[#allocation3] sm:$0xff] (!%p206_p3), %vm309_vm2, %v1043_v0  ;;  %315 = vst.msk [vmem:[#allocation3 + $0x8] sm:$0xff] (!%p206_p3), %vm309_vm2, %v1043_v0  ;;  %vm451_vm3 = vcmp.lt.s32.totalorder (!%p206_p3), %v448_v9, 10 }
   0xc   : > { %316 = vst.msk [vmem:[#allocation3 + $0x10] sm:$0xff] (!%p206_p3), %vm309_vm2, %v1043_v0  ;;  %317 = vst.msk [vmem:[#allocation3 + $0x18] sm:$0xff] (!%p206_p3), %vm309_vm2, %v1043_v0 }
   0xe   : > { %s1176_s16 = smov (!%p260_p4, %s891_s16), 3  ;;  %s1178_s12 = smov (!%p295_p5, %s1033_s12), 1 }
   0xf   : > { %s918_s17 = sshll.u32 %s1176_s16, 3  ;;  %s921_s28 = sshll.u32 %s1178_s12, 3 }
  0x10   : > { %s279_s20 = scalar_lea.vmem %s1168_s1, %s918_s17  ;;  %s267_s23 = scalar_lea.vmem %s1167_s0, %s918_s17  ;;  %v458_v27 = vld [vmem:[#allocation2 + $0x10] sm:$0xff]  ;;  %v1124_v29 = vld [vmem:[#allocation2] sm:$0xff] }
  0x11   : > { %v989_v1 = vld [vmem:[%s279_s20 + $0x8] sm:$0xff]   ;;  %v991_v3 = vld [vmem:[%s279_s20] sm:$0xff]   ;;  %s1105_s26 = scalar_lea.vmem %s1169_s2, %s918_s17  ;;  %v459_v31 = vld [vmem:[#allocation2 + $0x18] sm:$0xff]  ;;  %s302_s4 = scalar_lea.vmem %s1170_s3, %s921_s28 }
  0x12   : > { %v403_v2 = vsel %vm318_vm0, %v989_v1, 0  ;;  %v346_v4 = vsel %vm318_vm0, %v991_v3, 0  ;;  %v990_v5 = vld [vmem:[%s267_s23 + $0x8] sm:$0xff]   ;;  %v992_v6 = vld [vmem:[%s267_s23] sm:$0xff]  }
  0x13   : > { %941 = vmatpush3.bf16.xpose.msra.mxu1 %v403_v2  ;;  %935 = vmatpush3.bf16.xpose.msra.mxu0 %v346_v4  ;;  %v457_v36 = vld [vmem:[#allocation2 + $0x8] sm:$0xff]  ;;  %v994_v44 = vld [vmem:[%s1105_s26] sm:$0xff]  }
  0x14   : > { %952 = vmatprep.subr.bf16.mxu1 %v1043_v0  ;;  %946 = vmatprep.subr.bf16.mxu0 %v1043_v0  ;;  %v993_v43 = vld [vmem:[%s1105_s26 + $0x8] sm:$0xff]  }
  0x1a   : > { %943 = vmatmul.mubr.msk.bf16.vlgmr.msra.gmra.mrb[0].mxu1 %vm318_vm0, %v990_v5  ;;  %937 = vmatmul.mubr.msk.bf16.vlgmr.msra.gmra.mrb[0].mxu0 %vm318_vm0, %v992_v6 }
  0x1b   : > { %954 = vmatprep.mubr.msk.bf16.mxu1 %vm1044_vm1, %v1043_v0  ;;  %948 = vmatprep.mubr.msk.bf16.mxu0 %vm1044_vm1, %v1043_v0 }
  0x1c   : > { %953 = vmatpush3.bf16.msra.mxu1 %v993_v43  ;;  %947 = vmatpush3.bf16.msra.mxu0 %v994_v44 }
  0xed   : > { %v439_v10 = vpop.f32.mrb[0].mxu1  ;;  %v382_v15 = vpop.f32.mrb[0].mxu0 }
  0xee   : > { %v454_v11 = vsel %vm451_vm3, %v439_v10, -1e+30  ;;  %v944_v12 = vpop.f32.mrb[1].mxu1  ;;  %v452_v18 = vsel %vm451_vm3, %v382_v15, -1e+30  ;;  %v938_v19 = vpop.f32.mrb[1].mxu0 }
  0xef   : > { %v442_v13 = vpop.f32.mrb[2].mxu1  ;;  %v466_v14 = vsel %vm318_vm0, %v454_v11, -inf  ;;  %v460_v20 = vsel %vm318_vm0, %v452_v18, -inf  ;;  %v385_v21 = vpop.f32.mrb[2].mxu0  ;;  %v522_v10 = vld [vmem:[#allocation3 + $0x10] sm:$0xff] }
  0xf0   : > { %v455_v16 = vsel %vm451_vm3, %v442_v13, -1e+30  ;;  %467 = vmax.xlane.f32.xlu0 %v466_v14  ;;  %v945_v17 = vpop.f32.mrb[3].mxu1  ;;  %461 = vmax.xlane.f32.xlu1 %v460_v20  ;;  %v453_v22 = vsel %vm451_vm3, %v385_v21, -1e+30  ;;  %v939_v23 = vpop.f32.mrb[3].mxu0 }
  0xf1   : > { %v469_v24 = vsel %vm318_vm0, %v455_v16, -inf  ;;  %v463_v25 = vsel %vm318_vm0, %v453_v22, -inf  ;;  %v523_v13 = vld [vmem:[#allocation3 + $0x18] sm:$0xff] }
  0xf4   : > { %470 = vmax.xlane.f32.xlu0 %v469_v24  ;;  %464 = vmax.xlane.f32.xlu1 %v463_v25 }
 0x17d   : > { %v468_v28 = vpop.xlane.xlu0 %467  ;;  %v462_v32 = vpop.xlane.xlu1 %461 }
 0x17e   : > { %v474_v30 = vmax.f32 %v458_v27, %v468_v28  ;;  %v1128_v34 = vmax.f32 %v1124_v29, %v462_v32 }
 0x180   : > { %v478_v33 = vsub.f32 %v458_v27, %v474_v30  ;;  %693 = vst.msk [vmem:[#allocation2 + $0x10] sm:$0xff] %vm309_vm2, %v474_v30  ;;  %500 = vperm.xlu0 %987, %v474_v30   ;;  %v476_v38 = vsub.f32 %v1124_v29, %v1128_v34  ;;  %691 = vst.msk [vmem:[#allocation2] sm:$0xff] %vm309_vm2, %v1128_v34  ;;  %v521_v30 = vld [vmem:[#allocation3 + $0x8] sm:$0xff] }
 0x181   : > { %v471_v35 = vpop.xlane.xlu0 %470  ;;  %v465_v39 = vpop.xlane.xlu1 %464 }
 0x182   : > { %v475_v37 = vmax.f32 %v459_v31, %v471_v35  ;;  %v473_v41 = vmax.f32 %v457_v36, %v465_v39  ;;  %v484_v1 = vmul.f32 1.442695, %v478_v33  ;;  %v480_v9 = vmul.f32 1.442695, %v476_v38 }
 0x184   : > { %v479_v40 = vsub.f32 %v459_v31, %v475_v37  ;;  %694 = vst.msk [vmem:[#allocation2 + $0x18] sm:$0xff] %vm309_vm2, %v475_v37  ;;  %505 = vperm.xlu1 %988, %v475_v37   ;;  %v477_v42 = vsub.f32 %v457_v36, %v473_v41  ;;  %692 = vst.msk [vmem:[#allocation2 + $0x8] sm:$0xff] %vm309_vm2, %v473_v41  ;;  %v658_v36 = vld [vmem:[#allocation4 + $0x18] sm:$0xff] }
 0x186   : > { %v486_v2 = vmul.f32 1.442695, %v479_v40  ;;  %v482_v4 = vmul.f32 1.442695, %v477_v42 }
 0x188   : > { %490 = vperm.xlu1 %988, %v1128_v34   ;;  %v657_v34 = vld [vmem:[#allocation4 + $0x10] sm:$0xff] }
 0x18c   : > { %495 = vperm.xlu1 %988, %v473_v41  }
 0x1ff   : > { %v501_v45 = vpop.permute.xlu0 %500 }
 0x200   : > { %v510_v46 = vsub.f32 %v454_v11, %v501_v45 }
 0x202   : > { %v516_v47 = vmul.f32 1.442695, %v510_v46  ;;  %v656_v46 = vld [vmem:[#allocation4 + $0x8] sm:$0xff] }
 0x203   : > { %v506_v48 = vpop.permute.xlu1 %505 }
 0x204   : > { %995 = vpow2.f32 %v516_v47  ;;  %v511_v49 = vsub.f32 %v455_v16, %v506_v48 }
 0x206   : > { %v518_v50 = vmul.f32 1.442695, %v511_v49 }
 0x207   : > { %v491_v51 = vpop.permute.xlu1 %490 }
 0x208   : > { %997 = vpow2.f32 %v518_v50  ;;  %v508_v52 = vsub.f32 %v452_v18, %v491_v51  ;;  %v520_v18 = vld [vmem:[#allocation3] sm:$0xff] }
 0x20a   : > { %v512_v53 = vmul.f32 1.442695, %v508_v52 }
 0x20b   : > { %v496_v54 = vpop.permute.xlu1 %495 }
 0x20c   : > { %999 = vpow2.f32 %v512_v53  ;;  %v509_v55 = vsub.f32 %v453_v22, %v496_v54 }
 0x20e   : > { %v996_v56 = vpop.eup %995  ;;  %v514_v57 = vmul.f32 1.442695, %v509_v55 }
 0x20f   : > { %v534_v58 = vsel %vm318_vm0, %v996_v56, 0.0 }
 0x210   : > { %1001 = vpow2.f32 %v514_v57  ;;  %535 = vadd.xlane.f32.xlu1 %v534_v58 }
 0x211   : > { %1003 = vpow2.f32 %v484_v1 }
 0x212   : > { %v998_v59 = vpop.eup %997  ;;  %1005 = vpow2.f32 %v486_v2 }
 0x213   : > { %v537_v60 = vsel %vm318_vm0, %v998_v59, 0.0  ;;  %v550_v61 = vpack.c.bf16 %v998_v59, %v996_v56  ;;  %1007 = vpow2.f32 %v482_v4 }
 0x214   : > { %538 = vadd.xlane.f32.xlu0 %v537_v60  ;;  %1009 = vpow2.f32 %v480_v9 }
 0x215   : > { %955 = vmatmul.mubr.msk.bf16.vlgmr.msra.gmra.mrb[4].mxu1 %vm318_vm0, %v550_v61 }
 0x216   : > { %v1000_v62 = vpop.eup %999 }
 0x217   : > { %v528_v63 = vsel %vm318_vm0, %v1000_v62, 0.0 }
 0x218   : > { %529 = vadd.xlane.f32.xlu1 %v528_v63 }
 0x21a   : > { %v1002_v0 = vpop.eup %1001 }
 0x21b   : > { %v549_v3 = vpack.c.bf16 %v1002_v0, %v1000_v62  ;;  %v1004_v5 = vpop.eup %1003  ;;  %v531_v8 = vsel %vm318_vm0, %v1002_v0, 0.0  ;;  %v655_v62 = vld [vmem:[#allocation4] sm:$0xff] }
 0x21c   : > { %v1006_v6 = vpop.eup %1005  ;;  %v526_v11 = vmul.f32 %v1004_v5, %v522_v10 }
 0x21d   : > { %949 = vmatmul.mubr.msk.bf16.vlgmr.msra.gmra.mrb[4].mxu0 %vm318_vm0, %v549_v3  ;;  %v1008_v7 = vpop.eup %1007  ;;  %v527_v15 = vmul.f32 %v1006_v6, %v523_v13 }
 0x21e   : > { %v1010_v16 = vpop.eup %1009  ;;  %v525_v31 = vmul.f32 %v1008_v7, %v521_v30 }
 0x21f   : > { %v524_v20 = vmul.f32 %v1010_v16, %v520_v18 }
 0x229   : > { %671 = vperm.xlu1 %988, %v1004_v5  }
 0x22a   : > { %676 = vperm.xlu0 %987, %v1006_v6  }
 0x22e   : > { %666 = vperm.xlu0 %987, %v1008_v7  }
 0x24d   : > { %532 = vadd.xlane.f32.xlu1 %v531_v8 }
 0x29d   : > { %v536_v12 = vpop.xlane.xlu1 %535 }
 0x29e   : > { %v542_v14 = vadd.f32 %v536_v12, %v526_v11 }
 0x2a0   : > { %547 = vst.msk [vmem:[#allocation3 + $0x10] sm:$0xff] %vm309_vm2, %v542_v14 }
 0x2a1   : > { %v539_v17 = vpop.xlane.xlu0 %538 }
 0x2a2   : > { %v543_v19 = vadd.f32 %v539_v17, %v527_v15 }
 0x2a4   : > { %548 = vst.msk [vmem:[#allocation3 + $0x18] sm:$0xff] %vm309_vm2, %v543_v19 }
 0x2a5   : > { %v530_v21 = vpop.xlane.xlu1 %529 }
 0x2a6   : > { %v540_v22 = vadd.f32 %v530_v21, %v524_v20 }
 0x2a7   : > { %v700_v23 = vld [vmem:[#allocation3 + $0x10] sm:$0xff] }
 0x2a8   : > { %545 = vst.msk [vmem:[#allocation3] sm:$0xff] %vm309_vm2, %v540_v22  ;;  %1011 = vrcp.f32 %v700_v23 }
 0x2a9   : > { %v672_v29 = vpop.permute.xlu1 %671  ;;  %v677_v37 = vpop.permute.xlu0 %676 }
 0x2aa   : > { %v681_v38 = vmul.f32 %v672_v29, %v657_v34  ;;  %v682_v40 = vmul.f32 %v677_v37, %v658_v36 }
 0x2ab   : > { %v701_v24 = vld [vmem:[#allocation3 + $0x18] sm:$0xff] }
 0x2ac   : > { %1013 = vrcp.f32 %v701_v24 }
 0x2ad   : > { %v667_v47 = vpop.permute.xlu0 %666 }
 0x2ae   : > { %v680_v50 = vmul.f32 %v667_v47, %v656_v46 }
 0x2af   : > { %v698_v25 = vld [vmem:[#allocation3] sm:$0xff] }
 0x2b0   : > { %1015 = vrcp.f32 %v698_v25 }
 0x2b2   : > { %v1012_v26 = vpop.eup %1011 }
 0x2b3   : > { %722 = vperm.xlu1 %988, %v1012_v26  }
 0x2b6   : > { %v1014_v27 = vpop.eup %1013 }
 0x2b7   : > { %727 = vperm.xlu1 %988, %v1014_v27  }
 0x2ba   : > { %v1016_v28 = vpop.eup %1015 }
 0x2bb   : > { %661 = vperm.xlu1 %988, %v1010_v16  }
 0x2bf   : > { %712 = vperm.xlu1 %988, %v1016_v28  }
 0x2da   : > { %v533_v32 = vpop.xlane.xlu1 %532 }
 0x2db   : > { %v541_v33 = vadd.f32 %v533_v32, %v525_v31 }
 0x2dd   : > { %546 = vst.msk [vmem:[#allocation3 + $0x8] sm:$0xff] %vm309_vm2, %v541_v33 }
 0x2e4   : > { %v699_v35 = vld [vmem:[#allocation3 + $0x8] sm:$0xff] }
 0x2e5   : > { %1017 = vrcp.f32 %v699_v35 }
 0x2e8   : > { %v648_v39 = vpop.f32.mrb[4].mxu1 }
 0x2e9   : > { %v685_v41 = vadd.f32 %v681_v38, %v648_v39  ;;  %v956_v42 = vpop.f32.mrb[5].mxu1 }
 0x2ea   : > { %v651_v43 = vpop.f32.mrb[6].mxu1 }
 0x2eb   : > { %689 = vst.msk [vmem:[#allocation4 + $0x10] sm:$0xff] %vm318_vm0, %v685_v41  ;;  %v686_v44 = vadd.f32 %v682_v40, %v651_v43  ;;  %v957_v45 = vpop.f32.mrb[7].mxu1 }
 0x2ed   : > { %690 = vst.msk [vmem:[#allocation4 + $0x18] sm:$0xff] %vm318_vm0, %v686_v44 }
 0x2ef   : > { %v1018_v48 = vpop.eup %1017 }
 0x2f0   : > { %717 = vperm.xlu0 %987, %v1018_v48   ;;  %v598_v49 = vpop.f32.mrb[4].mxu0 }
 0x2f1   : > { %v950_v51 = vpop.f32.mrb[5].mxu0 }
 0x2f2   : > { %v601_v52 = vpop.f32.mrb[6].mxu0  ;;  %v708_v55 = vld [vmem:[#allocation4 + $0x10] sm:$0xff] }
 0x2f3   : > { %v684_v53 = vadd.f32 %v680_v50, %v601_v52  ;;  %v951_v54 = vpop.f32.mrb[7].mxu0 }
 0x2f4   : > { %v709_v59 = vld [vmem:[#allocation4 + $0x18] sm:$0xff] }
 0x2f5   : > { %688 = vst.msk [vmem:[#allocation4 + $0x8] sm:$0xff] %vm318_vm0, %v684_v53 }
 0x2fc   : > { %v707_v8 = vld [vmem:[#allocation4 + $0x8] sm:$0xff] }
 0x332   : > { %v723_v56 = vpop.permute.xlu1 %722 }
 0x333   : > { %v732_v57 = vmul.f32 %v723_v56, %v708_v55 }
 0x335   : > { %v924_v58 = vpack.c.bf16 %v732_v57, %v732_v57 }
 0x336   : > { %v728_v60 = vpop.permute.xlu1 %727 }
 0x337   : > { %v733_v61 = vmul.f32 %v728_v60, %v709_v59  ;;  %751 = vrot.lane.b32.xlu1 %v924_v58, %s1047_s27 }
 0x339   : > { %v925_v63 = vpack.c.bf16 %v733_v61, %v733_v61 }
 0x33a   : > { %v662_v0 = vpop.permute.xlu1 %661 }
 0x33b   : > { %v679_v1 = vmul.f32 %v662_v0, %v655_v62  ;;  %753 = vrot.lane.b32.xlu0 %v925_v63, %s1047_s27 }
 0x33d   : > { %v683_v2 = vadd.f32 %v679_v1, %v598_v49 }
 0x33e   : > { %v713_v3 = vpop.permute.xlu1 %712 }
 0x33f   : > { %687 = vst.msk [vmem:[#allocation4] sm:$0xff] %vm318_vm0, %v683_v2 }
 0x346   : > { %v706_v4 = vld [vmem:[#allocation4] sm:$0xff] }
 0x347   : > { %v730_v5 = vmul.f32 %v713_v3, %v706_v4 }
 0x349   : > { %v922_v6 = vpack.c.bf16 %v730_v5, %v730_v5 }
 0x34b   : > { %743 = vst.msk [vmem:[%s302_s4] sm:$0xf] %vm742_vm4, %v922_v6 }
 0x36f   : > { %v718_v7 = vpop.permute.xlu0 %717 }
 0x370   : > { %v731_v9 = vmul.f32 %v718_v7, %v707_v8 }
 0x372   : > { %v923_v10 = vpack.c.bf16 %v731_v9, %v731_v9 }
 0x374   : > { %744 = vst.msk [vmem:[%s302_s4 + $0x4] sm:$0xf] %vm742_vm4, %v923_v10 }
 0x3a9   : > { %v752_v11 = vpop.permute.xlu1 %751 }
 0x3aa   : > { %758 = vst.msk [vmem:[%s302_s4] sm:$0xf] %vm757_vm5, %v752_v11 }
 0x3ad   : > { %v754_v12 = vpop.permute.xlu0 %753 }
 0x3ae   : > { %759 = vst.msk [vmem:[%s302_s4 + $0x4] sm:$0xf] %vm757_vm5, %v754_v12 }
 0x3af PF: > { %s13_s14 = sadd.s32 1, %s1041_s14   ;;  %s1171_s12 = smov %s1037_s13 }
 0x3b0   : > { %p10_p6 = scmp.ge.s32.totalorder %s13_s14, 4   ;;  %s1172_s13 = smov %s1174_s15 }
 0x3b2   :  { %12 = sbr.rel (!%p10_p6) target bundleno = 2 (0x2), region = 76 }

// kernel: tc_vision_transformer_forward.18
= control target key start
LH: loop header
LB: loop body
LE: loop exit
PB: predicated region body
PF: predicated region fallthrough
CT: control target
= control target key end

     0   :  { %vm24_vm0 = vcmask 261120   ;;  %s329_s0 = inlined_call_operand.vmem [shape: f32[24,32], index: 0, kind: input, shape index: {}]   ;;  %s330_s3 = inlined_call_operand.vmem [shape: bf16[32,128], index: 3, kind: input, shape index: {}]   ;;  %s331_s1 = inlined_call_operand.vmem [shape: f32[1,32], index: 1, kind: input, shape index: {}]   ;;  %s332_s2 = inlined_call_operand.vmem [shape: f32[1,32], index: 2, kind: input, shape index: {}]   ;;  %s333_s4 = inlined_call_operand.vmem [shape: f32[1,128], index: 4, kind: input, shape index: {}]   ;;  %s334_s5 = inlined_call_operand.vmem [shape: bf16[24,128], index: 5, kind: output, shape index: {}]  }
   0x1   :  { %v21_v0 = vld [vmem:[%s329_s0] sm:$0xff]  ;;  %v23_v1 = vld [vmem:[%s329_s0 + $0x10] sm:$0xff]  ;;  %v22_v2 = vld [vmem:[%s329_s0 + $0x8] sm:$0xff] }
   0x2   :  { %v25_v3 = vsel %vm24_vm0, %v21_v0, 0.0  ;;  %v31_v4 = vsel %vm24_vm0, %v23_v1, 0.0  ;;  %v28_v5 = vsel %vm24_vm0, %v22_v2, 0.0  ;;  %v241_v21 = vld [vmem:[%s330_s3] sm:$0xff]   ;;  %v242_v22 = vld [vmem:[%s330_s3 + $0x8] sm:$0xff]  }
   0x3   :  { %26 = vadd.xlane.f32.xlu0 %v25_v3  ;;  %32 = vadd.xlane.f32.xlu1 %v31_v4  ;;  %v208_v34 = vld [vmem:[%s331_s1] ss:$0 sm:$0xff] }
   0x4   :  { %233 = vmatprep.subr.bf16.mxu0 %v241_v21  ;;  %v209_v40 = vld [vmem:[%s332_s2] ss:$0 sm:$0xff] }
   0x5   :  { %234 = vmatpush3.bf16.msra.mxu0 %v241_v21  ;;  %v210_v48 = vld [vmem:[%s333_s4] ss:$0 sm:$0xff] }
   0x6   :  { %235 = vmatprep.subr.bf16.mxu0 %v242_v22 }
   0x7   :  { %29 = vadd.xlane.f32.xlu0 %v28_v5 }
   0x9   :  { %236 = vmatpush3.bf16.msra.mxu0 %v242_v22 }
  0x90   :  { %v27_v6 = vpop.xlane.xlu0 %26  ;;  %v33_v7 = vpop.xlane.xlu1 %32 }
  0x91   :  { %v35_v8 = vmul.f32 0.03125, %v27_v6  ;;  %v37_v9 = vmul.f32 0.03125, %v33_v7 }
  0x93   :  { %v38_v10 = vsub.f32 %v21_v0, %v35_v8  ;;  %v40_v11 = vsub.f32 %v23_v1, %v37_v9 }
  0x94   :  { %v30_v12 = vpop.xlane.xlu0 %29 }
  0x95   :  { %v36_v13 = vmul.f32 0.03125, %v30_v12  ;;  %v41_v14 = vmul.f32 %v38_v10, %v38_v10  ;;  %v43_v15 = vmul.f32 %v40_v11, %v40_v11 }
  0x97   :  { %v39_v16 = vsub.f32 %v22_v2, %v36_v13  ;;  %v44_v17 = vsel %vm24_vm0, %v41_v14, 0.0  ;;  %v50_v18 = vsel %vm24_vm0, %v43_v15, 0.0 }
  0x98   :  { %45 = vadd.xlane.f32.xlu1 %v44_v17 }
  0x99   :  { %v42_v19 = vmul.f32 %v39_v16, %v39_v16 }
  0x9b   :  { %v47_v20 = vsel %vm24_vm0, %v42_v19, 0.0 }
  0x9c   :  { %51 = vadd.xlane.f32.xlu1 %v50_v18  ;;  %48 = vadd.xlane.f32.xlu0 %v47_v20 }
 0x125   :  { %v46_v23 = vpop.xlane.xlu1 %45 }
 0x126   :  { %v53_v24 = vmul.f32 0.03125, %v46_v23 }
 0x128   :  { %v56_v25 = vadd.f32 1e-05, %v53_v24 }
 0x129   :  { %v52_v26 = vpop.xlane.xlu1 %51  ;;  %v49_v27 = vpop.xlane.xlu0 %48 }
 0x12a   :  { %243 = vrsqrt.f32 %v56_v25  ;;  %v55_v28 = vmul.f32 0.03125, %v52_v26  ;;  %v54_v29 = vmul.f32 0.03125, %v49_v27 }
 0x12c   :  { %v58_v30 = vadd.f32 1e-05, %v55_v28  ;;  %v57_v31 = vadd.f32 1e-05, %v54_v29 }
 0x12e   :  { %245 = vrsqrt.f32 %v58_v30 }
 0x12f   :  { %247 = vrsqrt.f32 %v57_v31 }
 0x134   :  { %v244_v32 = vpop.eup %243 }
 0x135   :  { %v62_v33 = vmul.f32 %v244_v32, %v38_v10 }
 0x137   :  { %v72_v39 = vmul.f32 %v208_v34, %v62_v33 }
 0x138   :  { %v246_v35 = vpop.eup %245 }
 0x139   :  { %v248_v36 = vpop.eup %247  ;;  %v64_v37 = vmul.f32 %v246_v35, %v40_v11  ;;  %v82_v44 = vadd.f32 %v209_v40, %v72_v39 }
 0x13a   :  { %v63_v38 = vmul.f32 %v248_v36, %v39_v16 }
 0x13b   :  { %v74_v41 = vmul.f32 %v208_v34, %v64_v37 }
 0x13c   :  { %v73_v42 = vmul.f32 %v208_v34, %v63_v38 }
 0x13d   :  { %v84_v43 = vadd.f32 %v209_v40, %v74_v41 }
 0x13e   :  { %v83_v45 = vadd.f32 %v209_v40, %v73_v42 }
 0x13f   :  { %v86_v46 = vpack.c.bf16 %v84_v43, %v84_v43 }
 0x140   :  { %v85_v47 = vpack.c.bf16 %v83_v45, %v82_v44 }
 0x142   :  { %237 = vmatprep.mubr.msk.bf16.mxu0 %vm24_vm0, %v85_v47 }
 0x143   :  { %238 = vmatmul.mubr.msk.bf16.vlgmr.msra.gmra.mrb[0].mxu0 %vm24_vm0, %v86_v46 }
 0x216   :  { %v239_v49 = vpop.f32.mrb[0].mxu0 }
 0x217   :  { %v159_v50 = vadd.f32 %v239_v49, %v210_v48  ;;  %v150_v51 = vpop.f32.mrb[1].mxu0 }
 0x218   :  { %v151_v52 = vadd.f32 %v210_v48, %v150_v51  ;;  %v240_v53 = vpop.f32.mrb[2].mxu0 }
 0x219   :  { %v217_v54 = vmul.f32 -1.702, %v159_v50  ;;  %v153_v55 = vpop.f32.mrb[3].mxu0 }
 0x21a   :  { %v215_v56 = vmul.f32 -1.702, %v151_v52  ;;  %v154_v57 = vadd.f32 %v210_v48, %v153_v55 }
 0x21b   :  { %v174_v58 = vmul.f32 1.442695, %v217_v54 }
 0x21c   :  { %v170_v59 = vmul.f32 1.442695, %v215_v56  ;;  %v216_v60 = vmul.f32 -1.702, %v154_v57 }
 0x21d   :  { %249 = vpow2.f32 %v174_v58 }
 0x21e   :  { %251 = vpow2.f32 %v170_v59  ;;  %v172_v61 = vmul.f32 1.442695, %v216_v60 }
 0x220   :  { %253 = vpow2.f32 %v172_v61 }
 0x227   :  { %v250_v62 = vpop.eup %249 }
 0x228   :  { %v252_v63 = vpop.eup %251  ;;  %v178_v0 = vadd.f32 1.0, %v250_v62 }
 0x229   :  { %v176_v1 = vadd.f32 1.0, %v252_v63 }
 0x22a   :  { %v254_v2 = vpop.eup %253  ;;  %255 = vrcp.f32 %v178_v0 }
 0x22b   :  { %257 = vrcp.f32 %v176_v1  ;;  %v177_v3 = vadd.f32 1.0, %v254_v2 }
 0x22d   :  { %259 = vrcp.f32 %v177_v3 }
 0x234   :  { %v256_v4 = vpop.eup %255 }
 0x235   :  { %v258_v5 = vpop.eup %257  ;;  %v187_v6 = vmul.f32 %v256_v4, %v159_v50 }
 0x236   :  { %v185_v9 = vmul.f32 %v258_v5, %v151_v52 }
 0x237   :  { %v260_v7 = vpop.eup %259  ;;  %v223_v8 = vpack.c.bf16 %v187_v6, %v187_v6 }
 0x238   :  { %v186_v10 = vmul.f32 %v260_v7, %v154_v57 }
 0x239   :  { %203 = vst [vmem:[%s334_s5 + $0x8] sm:$0xf] %v223_v8 }
 0x23a   :  { %v227_v11 = vpack.c.bf16 %v186_v10, %v185_v9 }
 0x23c   :  { %228 = vst [vmem:[%s334_s5] sm:$0xff] %v227_v11  }

// kernel: tc_vision_transformer_forward.19
= control target key start
LH: loop header
LB: loop body
LE: loop exit
PB: predicated region body
PF: predicated region fallthrough
CT: control target
= control target key end

     0   :  { %s290_s1 = inlined_call_operand.vmem [shape: bf16[128,128], index: 1, kind: input, shape index: {}]   ;;  %s291_s0 = inlined_call_operand.vmem [shape: bf16[24,128], index: 0, kind: input, shape index: {}]   ;;  %s292_s2 = inlined_call_operand.vmem [shape: f32[1,128], index: 2, kind: input, shape index: {}]   ;;  %s293_s3 = inlined_call_operand.vmem [shape: f32[24,128], index: 3, kind: input, shape index: {}]   ;;  %s294_s4 = inlined_call_operand.vmem [shape: f32[24,128], index: 4, kind: output, shape index: {}]  }
   0x1   :  { %v204_v0 = vld [vmem:[%s290_s1] sm:$0xff]   ;;  %v205_v1 = vld [vmem:[%s290_s1 + $0x8] sm:$0xff]   ;;  %v206_v2 = vld [vmem:[%s290_s1 + $0x10] sm:$0xff]  }
   0x2   :  { %184 = vmatprep.subr.bf16.mxu0 %v204_v0  ;;  %v207_v3 = vld [vmem:[%s290_s1 + $0x18] sm:$0xff]   ;;  %v212_v4 = vld [vmem:[%s291_s0] sm:$0xff]   ;;  %v209_v6 = vld [vmem:[%s290_s1 + $0x28] sm:$0xff]  }
   0x3   :  { %185 = vmatpush3.bf16.msra.mxu0 %v204_v0  ;;  %200 = vmatprep.mubr.bf16.mxu0 %v212_v4  ;;  %v208_v5 = vld [vmem:[%s290_s1 + $0x20] sm:$0xff]   ;;  %v210_v7 = vld [vmem:[%s290_s1 + $0x30] sm:$0xff]   ;;  %v211_v8 = vld [vmem:[%s290_s1 + $0x38] sm:$0xff]  }
   0x4   :  { %186 = vmatprep.subr.bf16.mxu0 %v205_v1  ;;  %v213_v9 = vld [vmem:[%s291_s0 + $0x8] ss:$0 sps:$4 sm:$0xff]   ;;  %v163_v10 = vld [vmem:[%s292_s2] ss:$0 sm:$0xff]  ;;  %v152_v12 = vld [vmem:[%s293_s3 + $0x10] sm:$0xff] }
   0x5   :  { %v150_v15 = vld [vmem:[%s293_s3] sm:$0xff]  ;;  %v151_v20 = vld [vmem:[%s293_s3 + $0x8] sm:$0xff] }
   0x7   :  { %187 = vmatpush3.bf16.msra.mxu0 %v205_v1 }
   0x8   :  { %188 = vmatprep.subr.bf16.mxu0 %v206_v2 }
   0xb   :  { %189 = vmatpush3.bf16.msra.mxu0 %v206_v2 }
   0xc   :  { %190 = vmatprep.subr.bf16.mxu0 %v207_v3 }
   0xf   :  { %191 = vmatpush3.bf16.msra.mxu0 %v207_v3 }
  0x10   :  { %192 = vmatprep.subr.bf16.mxu0 %v208_v5 }
  0x13   :  { %193 = vmatpush3.bf16.msra.mxu0 %v208_v5 }
  0x14   :  { %194 = vmatprep.subr.bf16.mxu0 %v209_v6 }
  0x17   :  { %195 = vmatpush3.bf16.msra.mxu0 %v209_v6 }
  0x18   :  { %196 = vmatprep.subr.bf16.mxu0 %v210_v7 }
  0x1b   :  { %197 = vmatpush3.bf16.msra.mxu0 %v210_v7 }
  0x1c   :  { %198 = vmatprep.subr.bf16.mxu0 %v211_v8 }
  0x1f   :  { %199 = vmatpush3.bf16.msra.mxu0 %v211_v8 }
  0x22   :  { %201 = vmatmul.mubr.bf16.vlgmr.msra.gmra.mrb[0].mxu0 %v213_v9 }
  0xf5   :  { %v202_v11 = vpop.f32.mrb[0].mxu0 }
  0xf6   :  { %v145_v13 = vadd.f32 %v202_v11, %v163_v10  ;;  %v136_v14 = vpop.f32.mrb[1].mxu0 }
  0xf7   :  { %v137_v16 = vadd.f32 %v163_v10, %v136_v14  ;;  %v203_v17 = vpop.f32.mrb[2].mxu0 }
  0xf8   :  { %v155_v18 = vadd.f32 %v152_v12, %v145_v13  ;;  %v139_v19 = vpop.f32.mrb[3].mxu0 }
  0xf9   :  { %v153_v21 = vadd.f32 %v150_v15, %v137_v16  ;;  %v140_v22 = vadd.f32 %v163_v10, %v139_v19 }
  0xfa   :  { %158 = vst [vmem:[%s294_s4 + $0x10] sm:$0xff] %v155_v18 }
  0xfb   :  { %156 = vst [vmem:[%s294_s4] sm:$0xff] %v153_v21  ;;  %v154_v23 = vadd.f32 %v151_v20, %v140_v22 }
  0xfd   :  { %157 = vst [vmem:[%s294_s4 + $0x8] sm:$0xff] %v154_v23 }

// kernel: tc_vision_transformer_forward.25
= control target key start
LH: loop header
LB: loop body
LE: loop exit
PB: predicated region body
PF: predicated region fallthrough
CT: control target
= control target key end

     0   :  { %vm24_vm0 = vcmask 261120   ;;  %s269_s0 = inlined_call_operand.vmem [shape: f32[24,32], index: 0, kind: input, shape index: {}]   ;;  %s270_s3 = inlined_call_operand.vmem [shape: bf16[32,128], index: 3, kind: input, shape index: {}]   ;;  %s271_s1 = inlined_call_operand.vmem [shape: f32[1,32], index: 1, kind: input, shape index: {}]   ;;  %s272_s2 = inlined_call_operand.vmem [shape: f32[1,32], index: 2, kind: input, shape index: {}]   ;;  %s273_s4 = inlined_call_operand.vmem [shape: f32[1,128], index: 4, kind: input, shape index: {}]   ;;  %s274_s5 = inlined_call_operand.vmem [shape: f32[24,128], index: 5, kind: output, shape index: {}]  }
   0x1   :  { %v21_v0 = vld [vmem:[%s269_s0] sm:$0xff]  ;;  %v23_v1 = vld [vmem:[%s269_s0 + $0x10] sm:$0xff]  ;;  %v22_v2 = vld [vmem:[%s269_s0 + $0x8] sm:$0xff] }
   0x2   :  { %v25_v3 = vsel %vm24_vm0, %v21_v0, 0.0  ;;  %v31_v4 = vsel %vm24_vm0, %v23_v1, 0.0  ;;  %v28_v5 = vsel %vm24_vm0, %v22_v2, 0.0  ;;  %v190_v21 = vld [vmem:[%s270_s3] sm:$0xff]   ;;  %v191_v22 = vld [vmem:[%s270_s3 + $0x8] sm:$0xff]  }
   0x3   :  { %26 = vadd.xlane.f32.xlu0 %v25_v3  ;;  %32 = vadd.xlane.f32.xlu1 %v31_v4  ;;  %v171_v34 = vld [vmem:[%s271_s1] ss:$0 sm:$0xff] }
   0x4   :  { %182 = vmatprep.subr.bf16.mxu0 %v190_v21  ;;  %v172_v40 = vld [vmem:[%s272_s2] ss:$0 sm:$0xff] }
   0x5   :  { %183 = vmatpush3.bf16.msra.mxu0 %v190_v21  ;;  %v173_v48 = vld [vmem:[%s273_s4] ss:$0 sm:$0xff] }
   0x6   :  { %184 = vmatprep.subr.bf16.mxu0 %v191_v22 }
   0x7   :  { %29 = vadd.xlane.f32.xlu0 %v28_v5 }
   0x9   :  { %185 = vmatpush3.bf16.msra.mxu0 %v191_v22 }
  0x90   :  { %v27_v6 = vpop.xlane.xlu0 %26  ;;  %v33_v7 = vpop.xlane.xlu1 %32 }
  0x91   :  { %v35_v8 = vmul.f32 0.03125, %v27_v6  ;;  %v37_v9 = vmul.f32 0.03125, %v33_v7 }
  0x93   :  { %v38_v10 = vsub.f32 %v21_v0, %v35_v8  ;;  %v40_v11 = vsub.f32 %v23_v1, %v37_v9 }
  0x94   :  { %v30_v12 = vpop.xlane.xlu0 %29 }
  0x95   :  { %v36_v13 = vmul.f32 0.03125, %v30_v12  ;;  %v41_v14 = vmul.f32 %v38_v10, %v38_v10  ;;  %v43_v15 = vmul.f32 %v40_v11, %v40_v11 }
  0x97   :  { %v39_v16 = vsub.f32 %v22_v2, %v36_v13  ;;  %v44_v17 = vsel %vm24_vm0, %v41_v14, 0.0  ;;  %v50_v18 = vsel %vm24_vm0, %v43_v15, 0.0 }
  0x98   :  { %45 = vadd.xlane.f32.xlu1 %v44_v17 }
  0x99   :  { %v42_v19 = vmul.f32 %v39_v16, %v39_v16 }
  0x9b   :  { %v47_v20 = vsel %vm24_vm0, %v42_v19, 0.0 }
  0x9c   :  { %51 = vadd.xlane.f32.xlu1 %v50_v18  ;;  %48 = vadd.xlane.f32.xlu0 %v47_v20 }
 0x125   :  { %v46_v23 = vpop.xlane.xlu1 %45 }
 0x126   :  { %v53_v24 = vmul.f32 0.03125, %v46_v23 }
 0x128   :  { %v56_v25 = vadd.f32 1e-05, %v53_v24 }
 0x129   :  { %v52_v26 = vpop.xlane.xlu1 %51  ;;  %v49_v27 = vpop.xlane.xlu0 %48 }
 0x12a   :  { %192 = vrsqrt.f32 %v56_v25  ;;  %v55_v28 = vmul.f32 0.03125, %v52_v26  ;;  %v54_v29 = vmul.f32 0.03125, %v49_v27 }
 0x12c   :  { %v58_v30 = vadd.f32 1e-05, %v55_v28  ;;  %v57_v31 = vadd.f32 1e-05, %v54_v29 }
 0x12e   :  { %194 = vrsqrt.f32 %v58_v30 }
 0x12f   :  { %196 = vrsqrt.f32 %v57_v31 }
 0x134   :  { %v193_v32 = vpop.eup %192 }
 0x135   :  { %v62_v33 = vmul.f32 %v193_v32, %v38_v10 }
 0x137   :  { %v72_v39 = vmul.f32 %v171_v34, %v62_v33 }
 0x138   :  { %v195_v35 = vpop.eup %194 }
 0x139   :  { %v197_v36 = vpop.eup %196  ;;  %v64_v37 = vmul.f32 %v195_v35, %v40_v11  ;;  %v82_v44 = vadd.f32 %v172_v40, %v72_v39 }
 0x13a   :  { %v63_v38 = vmul.f32 %v197_v36, %v39_v16 }
 0x13b   :  { %v74_v41 = vmul.f32 %v171_v34, %v64_v37 }
 0x13c   :  { %v73_v42 = vmul.f32 %v171_v34, %v63_v38 }
 0x13d   :  { %v84_v43 = vadd.f32 %v172_v40, %v74_v41 }
 0x13e   :  { %v83_v45 = vadd.f32 %v172_v40, %v73_v42 }
 0x13f   :  { %v86_v46 = vpack.c.bf16 %v84_v43, %v84_v43 }
 0x140   :  { %v85_v47 = vpack.c.bf16 %v83_v45, %v82_v44 }
 0x142   :  { %186 = vmatprep.mubr.msk.bf16.mxu0 %vm24_vm0, %v85_v47 }
 0x143   :  { %187 = vmatmul.mubr.msk.bf16.vlgmr.msra.gmra.mrb[0].mxu0 %vm24_vm0, %v86_v46 }
 0x216   :  { %v188_v49 = vpop.f32.mrb[0].mxu0 }
 0x217   :  { %v159_v50 = vadd.f32 %v188_v49, %v173_v48  ;;  %v150_v51 = vpop.f32.mrb[1].mxu0 }
 0x218   :  { %v151_v52 = vadd.f32 %v173_v48, %v150_v51  ;;  %v189_v53 = vpop.f32.mrb[2].mxu0 }
 0x219   :  { %166 = vst [vmem:[%s274_s5 + $0x10] sm:$0xff] %v159_v50  ;;  %v153_v54 = vpop.f32.mrb[3].mxu0 }
 0x21a   :  { %164 = vst [vmem:[%s274_s5] sm:$0xff] %v151_v52  ;;  %v154_v55 = vadd.f32 %v173_v48, %v153_v54 }
 0x21c   :  { %165 = vst [vmem:[%s274_s5 + $0x8] sm:$0xff] %v154_v55 }

</bundles_post_ra>
